<compile_context>
chip_gen: v5e
topology: v5e:2x2
jax: 0.10.0
libtpu: 0.0.40
codegen_flags: <defaults>
</compile_context>

<pallas_src>
import functools
import math

import jax
import jax.numpy as jnp
from jax import lax
from jax.experimental import pallas as pl
from jax.experimental.pallas import tpu as pltpu


def _radial_flow_kernel(z_ref, x0_ref, alpha_ref, beta_ref, ab_ref,
                        zout_ref, slj_ref, *, c, dim, flow_length, chunk):
    # z_ref:     (dim, TN)   VMEM  -- batch on lanes, features on sublanes
    # x0_ref:    (c, dim, L) VMEM  -- resident, tiny
    # alpha_ref: (L, c, 1)   VMEM  -- softplus(alpha'), per layer/class
    # beta_ref:  (L, c, 1)   VMEM  -- -alpha + softplus(beta')
    # ab_ref:    (L, c, 1)   VMEM  -- alpha * beta
    # zout_ref:  (c, dim, TN) VMEM
    # slj_ref:   (c, TN)      VMEM (lane-dense log|det J| accumulator output)
    tn = z_ref.shape[1]
    n_chunks = tn // chunk  # static

    def chunk_body(k, carry):
        off = pl.multiple_of(k * chunk, chunk)
        z0 = z_ref[:, pl.ds(off, chunk)].astype(jnp.float32)     # (dim, chunk)

        # Per-class flow state (all classes start from the same z).
        z_cls = [z0 for _ in range(c)]
        x0_cls = [x0_ref[ic] for ic in range(c)]                 # (dim, L) each
        slj = jnp.zeros((c, chunk), jnp.float32)

        # c and flow_length are small & static -> unrolled Python loops.
        for l in range(flow_length):
            alpha = alpha_ref[l]                                 # (c, 1)
            beta = beta_ref[l]                                   # (c, 1)
            ab = ab_ref[l]                                       # (c, 1) = alpha*beta

            diffs = []
            r2_rows = []
            for ic in range(c):
                d = z_cls[ic] - x0_cls[ic][:, l:l + 1]           # (dim, chunk)
                diffs.append(d)
                # Sublane (XLU) reduce over dim -> (1, chunk) row.
                r2_rows.append(jnp.sum(d * d, axis=0, keepdims=True))

            # Pack the c classes onto sublanes: sqrt / reciprocal / log1p run
            # on dense (c, chunk) vregs instead of c sparse (1, chunk) rows.
            r = jnp.sqrt(jnp.concatenate(r2_rows, axis=0))       # (c, chunk)
            ar = alpha + r
            # EUP approximate reciprocal + one Newton step (rel err ~ eps^2).
            h0 = pl.reciprocal(ar, approx=True)
            h = h0 * (2.0 - ar * h0)                             # (c, chunk)
            beta_h = beta * h                                    # (c, chunk)

            # log|det J| = (dim-1)*log1p(beta*h) + log1p(beta*h + beta*h'*r)
            #            = (dim-1)*log1p(beta*h) + log1p(alpha*beta*h^2).
            slj = slj + (dim - 1) * jnp.log1p(beta_h) + jnp.log1p(ab * h * h)

            for ic in range(c):
                # (1, chunk) sublane-broadcast against the dense (dim, chunk) diff.
                z_cls[ic] = z_cls[ic] + beta_h[ic:ic + 1, :] * diffs[ic]

        for ic in range(c):
            zout_ref[ic, :, pl.ds(off, chunk)] = z_cls[ic].astype(zout_ref.dtype)
        slj_ref[:, pl.ds(off, chunk)] = slj                      # lane-dense store
        return carry

    lax.fori_loop(0, n_chunks, chunk_body, 0)


def batched_normalizing_flow_forward(z, x0_stack, alpha_stack, beta_stack, *,
                                     block_n=2048, chunk_n=256):
    """Pallas version of BatchedNormalizingFlowDensity.forward.

    z:           (N, dim)    float32
    x0_stack:    (L, c, dim) x0 of each BatchedRadial layer
    alpha_stack: (L, c)      alpha_prime of each layer
    beta_stack:  (L, c)      beta_prime of each layer
    Returns (z_out (c, N, dim), sum_log_jacobians (c, N)).

    block_n: N (lane) DMA-tile size per grid step; sweep 2048-4096.  VMEM is
    never the limit here (footprint < a few MiB even at 4096); size it by
    per-step overhead amortization.  chunk_n: inner compute chunk (vreg
    pressure bound), must stay modest (256 default) to avoid spills.
    """
    L, c, dim = x0_stack.shape
    n = z.shape[0]

    def round_up(a, b):
        return ((a + b - 1) // b) * b

    lane = 128
    n_lane = round_up(n, lane)

    # DMA tile over N.  Cap so the grid has >= 2 steps whenever N allows:
    # with dimension_semantics=("parallel",) v7x shards grid steps over its
    # 2 TensorCores, and a 1-step grid would idle one of them.
    tn = min(block_n, n_lane)
    if n_lane >= 2 * lane:
        tn = min(tn, round_up(n_lane // 2, lane))
    n_pad = round_up(n, tn)
    grid_n = n_pad // tn

    # Inner compute chunk: largest candidate that divides the tile.
    chunk = tn
    for cand in (chunk_n, 512, 256, 128):
        if cand <= tn and tn % cand == 0:
            chunk = cand
            break

    # --- layout plumbing (wrapper-side) ---
    z_t = jnp.transpose(z).astype(jnp.float32)                       # (dim, N)
    z_t = jnp.pad(z_t, ((0, 0), (0, n_pad - n)))                     # (dim, n_pad)
    x0_c = jnp.transpose(x0_stack, (1, 2, 0)).astype(jnp.float32)    # (c, dim, L)

    # Hoist softplus out of the kernel: only L*c scalars each.
    alphas = jax.nn.softplus(alpha_stack.astype(jnp.float32))        # (L, c)
    betas = -alphas + jax.nn.softplus(beta_stack.astype(jnp.float32))
    ab = alphas * betas
    alphas3 = alphas[..., None]                                      # (L, c, 1)
    betas3 = betas[..., None]
    ab3 = ab[..., None]

    kernel = functools.partial(_radial_flow_kernel, c=c, dim=dim,
                               flow_length=L, chunk=chunk)
    zout_t, slj = pl.pallas_call(
        kernel,
        out_shape=(jax.ShapeDtypeStruct((c, dim, n_pad), jnp.float32),
                   jax.ShapeDtypeStruct((c, n_pad), jnp.float32)),
        grid=(grid_n,),
        in_specs=[
            pl.BlockSpec((dim, tn), lambda j: (0, j)),          # z tile (lane-dense)
            pl.BlockSpec((c, dim, L), lambda j: (0, 0, 0)),     # x0 (resident, tiny)
            pl.BlockSpec((L, c, 1), lambda j: (0, 0, 0)),       # alpha table
            pl.BlockSpec((L, c, 1), lambda j: (0, 0, 0)),       # beta table
            pl.BlockSpec((L, c, 1), lambda j: (0, 0, 0)),       # alpha*beta table
        ],
        out_specs=(
            pl.BlockSpec((c, dim, tn), lambda j: (0, 0, j)),    # z_out (lane-dense)
            pl.BlockSpec((c, tn), lambda j: (0, j)),            # slj (lane-dense)
        ),
        compiler_params=pltpu.CompilerParams(
            dimension_semantics=("parallel",),       # shards N tiles over v7x's 2 TCs
            vmem_limit_bytes=32 * 1024 * 1024),      # safe on v5e/v6e/v7x
    )(z_t, x0_c, alphas3, betas3, ab3)

    # Back to the PyTorch result layout (module returns (c, N, dim)); see the
    # header note / TODO about fusing log_prob to avoid this round trip.
    z_out = jnp.transpose(zout_t[:, :, :n], (0, 2, 1))
    return z_out, slj[:, :n]


def _ref_forward(z, x0_stack, alpha_stack, beta_stack):
    """Pure-JAX reference mirroring the PyTorch module semantics exactly."""
    L, c, dim = x0_stack.shape
    zc = jnp.broadcast_to(z[None], (c,) + z.shape).astype(jnp.float32)
    slj = jnp.zeros((c, z.shape[0]), jnp.float32)
    for l in range(L):
        x0 = x0_stack[l]                          # (c, dim)
        alpha = jax.nn.softplus(alpha_stack[l])   # (c,)
        beta = -alpha + jax.nn.softplus(beta_stack[l])
        diff = zc - x0[:, None, :]
        r = jnp.linalg.norm(diff, axis=-1)        # (c, N)
        h = 1.0 / (alpha[:, None] + r)
        h_prime = -h ** 2
        beta_h = beta[:, None] * h
        slj = slj + (dim - 1) * jnp.log1p(beta_h) \
                  + jnp.log1p(beta_h + beta[:, None] * h_prime * r)
        zc = zc + beta_h[:, :, None] * diff
    return zc, slj


if __name__ == "__main__":
    # Small shapes consistent with the module: c classes, dim features,
    # flow_length radial layers, N input points of shape (N, dim).
    # N=1000 exercises the 2-step grid (megacore path), the inner chunk loop
    # and the lane padding while keeping the data tiny (~32 KB).
    c, dim, flow_length, n = 4, 8, 6, 1000

    key = jax.random.PRNGKey(0)
    k_z, k_p = jax.random.split(key)
    z = jax.random.normal(k_z, (n, dim), dtype=jnp.float32)

    # Deterministic parameter init matching BatchedRadial.reset_parameters:
    # uniform(-stdv, stdv) with stdv = 1/sqrt(dim), one set per flow layer.
    stdv = 1.0 / math.sqrt(dim)
    keys = jax.random.split(k_p, 3 * flow_length)
    x0_stack = jnp.stack([
        jax.random.uniform(keys[3 * l + 0], (c, dim),
                           minval=-stdv, maxval=stdv, dtype=jnp.float32)
        for l in range(flow_length)])
    alpha_stack = jnp.stack([
        jax.random.uniform(keys[3 * l + 1], (c,),
                           minval=-stdv, maxval=stdv, dtype=jnp.float32)
        for l in range(flow_length)])
    beta_stack = jnp.stack([
        jax.random.uniform(keys[3 * l + 2], (c,),
                           minval=-stdv, maxval=stdv, dtype=jnp.float32)
        for l in range(flow_length)])

    fwd = jax.jit(batched_normalizing_flow_forward)
    z_out, sum_log_jac = fwd(z, x0_stack, alpha_stack, beta_stack)
    jax.block_until_ready((z_out, sum_log_jac))

    # Correctness check against the pure-JAX reference.  Tolerances are
    # conservative; with the Newton-corrected reciprocal and the
    # cancellation-free log1p(alpha*beta*h^2) form the actual error is
    # far below them.
    z_expect, slj_expect = _ref_forward(z, x0_stack, alpha_stack, beta_stack)
    assert z_out.shape == (c, n, dim)
    assert sum_log_jac.shape == (c, n)
    assert jnp.allclose(z_out, z_expect, atol=2e-3, rtol=2e-3)
    assert jnp.allclose(sum_log_jac, slj_expect, atol=5e-3, rtol=5e-3)

    print("KERNEL_OK")
</pallas_src>

<mosaic_0001>
module attributes {stable_mosaic.version = 11 : i64} {
  func.func @_radial_flow_kernel(%arg0: i32, %arg1: memref<8x512xf32, #tpu.memory_space<vmem>>, %arg2: memref<4x8x6xf32, #tpu.memory_space<vmem>>, %arg3: memref<6x4x1xf32, #tpu.memory_space<vmem>>, %arg4: memref<6x4x1xf32, #tpu.memory_space<vmem>>, %arg5: memref<6x4x1xf32, #tpu.memory_space<vmem>>, %arg6: memref<4x8x512xf32, #tpu.memory_space<vmem>>, %arg7: memref<4x512xf32, #tpu.memory_space<vmem>>) attributes {dimension_semantics = [#tpu.dimension_semantics<parallel>], iteration_bounds = array<i64: 2>, scalar_prefetch = 0 : i64, scratch_operands = 0 : i64, tpu.core_type = #tpu.core_type<tc>, window_params = [{transform_indices = @transform_0, window_bounds = array<i64: 8, 512>}, {pipeline_mode = #tpu.pipeline_mode<synchronous>, transform_indices = @transform_1, window_bounds = array<i64: 4, 8, 6>}, {pipeline_mode = #tpu.pipeline_mode<synchronous>, transform_indices = @transform_2, window_bounds = array<i64: 6, 4, 1>}, {pipeline_mode = #tpu.pipeline_mode<synchronous>, transform_indices = @transform_3, window_bounds = array<i64: 6, 4, 1>}, {pipeline_mode = #tpu.pipeline_mode<synchronous>, transform_indices = @transform_4, window_bounds = array<i64: 6, 4, 1>}, {transform_indices = @transform_5, window_bounds = array<i64: 4, 8, 512>}, {transform_indices = @transform_6, window_bounds = array<i64: 4, 512>}]} {
    %c0_i32 = arith.constant 0 : i32
    %c2_i32 = arith.constant 2 : i32
    %0 = arith.addi %c0_i32, %c2_i32 : i32
    %c1_i32 = arith.constant 1 : i32
    scf.for %arg8 = %c0_i32 to %0 step %c1_i32  : i32 {
      %c256_i32 = arith.constant 256 : i32
      %1 = arith.muli %arg8, %c256_i32 : i32
      %2 = tpu.assume_multiple %1, 256 : i32
      %c0 = arith.constant 0 : index
      %3 = arith.index_cast %2 : i32 to index
      %4 = vector.load %arg1[%c0, %3] : memref<8x512xf32, #tpu.memory_space<vmem>>, vector<8x256xf32>
      %c0_1 = arith.constant 0 : index
      %c0_2 = arith.constant 0 : index
      %c0_3 = arith.constant 0 : index
      %5 = vector.load %arg2[%c0_1, %c0_2, %c0_3] : memref<4x8x6xf32, #tpu.memory_space<vmem>>, vector<1x8x6xf32>
      %6 = vector.shape_cast %5 : vector<1x8x6xf32> to vector<8x6xf32>
      %c1 = arith.constant 1 : index
      %c0_4 = arith.constant 0 : index
      %c0_5 = arith.constant 0 : index
      %7 = vector.load %arg2[%c1, %c0_4, %c0_5] : memref<4x8x6xf32, #tpu.memory_space<vmem>>, vector<1x8x6xf32>
      %8 = vector.shape_cast %7 : vector<1x8x6xf32> to vector<8x6xf32>
      %c2 = arith.constant 2 : index
      %c0_6 = arith.constant 0 : index
      %c0_7 = arith.constant 0 : index
      %9 = vector.load %arg2[%c2, %c0_6, %c0_7] : memref<4x8x6xf32, #tpu.memory_space<vmem>>, vector<1x8x6xf32>
      %10 = vector.shape_cast %9 : vector<1x8x6xf32> to vector<8x6xf32>
      %c3 = arith.constant 3 : index
      %c0_8 = arith.constant 0 : index
      %c0_9 = arith.constant 0 : index
      %11 = vector.load %arg2[%c3, %c0_8, %c0_9] : memref<4x8x6xf32, #tpu.memory_space<vmem>>, vector<1x8x6xf32>
      %12 = vector.shape_cast %11 : vector<1x8x6xf32> to vector<8x6xf32>
      %cst = arith.constant 0.000000e+00 : f32
      %13 = vector.broadcast %cst : f32 to vector<4x256xf32>
      %c0_10 = arith.constant 0 : index
      %c0_11 = arith.constant 0 : index
      %c0_12 = arith.constant 0 : index
      %14 = vector.load %arg3[%c0_10, %c0_11, %c0_12] : memref<6x4x1xf32, #tpu.memory_space<vmem>>, vector<1x4x1xf32>
      %15 = vector.shape_cast %14 : vector<1x4x1xf32> to vector<4x1xf32>
      %c0_13 = arith.constant 0 : index
      %c0_14 = arith.constant 0 : index
      %c0_15 = arith.constant 0 : index
      %16 = vector.load %arg4[%c0_13, %c0_14, %c0_15] : memref<6x4x1xf32, #tpu.memory_space<vmem>>, vector<1x4x1xf32>
      %17 = vector.shape_cast %16 : vector<1x4x1xf32> to vector<4x1xf32>
      %c0_16 = arith.constant 0 : index
      %c0_17 = arith.constant 0 : index
      %c0_18 = arith.constant 0 : index
      %18 = vector.load %arg5[%c0_16, %c0_17, %c0_18] : memref<6x4x1xf32, #tpu.memory_space<vmem>>, vector<1x4x1xf32>
      %19 = vector.shape_cast %18 : vector<1x4x1xf32> to vector<4x1xf32>
      %20 = vector.extract_strided_slice %6 {offsets = [0, 0], sizes = [8, 1], strides = [1, 1]} : vector<8x6xf32> to vector<8x1xf32>
      %21 = vector.broadcast %20 : vector<8x1xf32> to vector<8x256xf32>
      %22 = arith.subf %4, %21 : vector<8x256xf32>
      %23 = arith.mulf %22, %22 : vector<8x256xf32>
      %cst_19 = arith.constant dense<0.000000e+00> : vector<256xf32>
      %24 = vector.multi_reduction <add>, %23, %cst_19 [0] : vector<8x256xf32> to vector<256xf32>
      %25 = vector.shape_cast %24 : vector<256xf32> to vector<1x256xf32>
      %26 = vector.extract_strided_slice %8 {offsets = [0, 0], sizes = [8, 1], strides = [1, 1]} : vector<8x6xf32> to vector<8x1xf32>
      %27 = vector.broadcast %26 : vector<8x1xf32> to vector<8x256xf32>
      %28 = arith.subf %4, %27 : vector<8x256xf32>
      %29 = arith.mulf %28, %28 : vector<8x256xf32>
      %cst_20 = arith.constant dense<0.000000e+00> : vector<256xf32>
      %30 = vector.multi_reduction <add>, %29, %cst_20 [0] : vector<8x256xf32> to vector<256xf32>
      %31 = vector.shape_cast %30 : vector<256xf32> to vector<1x256xf32>
      %32 = vector.extract_strided_slice %10 {offsets = [0, 0], sizes = [8, 1], strides = [1, 1]} : vector<8x6xf32> to vector<8x1xf32>
      %33 = vector.broadcast %32 : vector<8x1xf32> to vector<8x256xf32>
      %34 = arith.subf %4, %33 : vector<8x256xf32>
      %35 = arith.mulf %34, %34 : vector<8x256xf32>
      %cst_21 = arith.constant dense<0.000000e+00> : vector<256xf32>
      %36 = vector.multi_reduction <add>, %35, %cst_21 [0] : vector<8x256xf32> to vector<256xf32>
      %37 = vector.shape_cast %36 : vector<256xf32> to vector<1x256xf32>
      %38 = vector.extract_strided_slice %12 {offsets = [0, 0], sizes = [8, 1], strides = [1, 1]} : vector<8x6xf32> to vector<8x1xf32>
      %39 = vector.broadcast %38 : vector<8x1xf32> to vector<8x256xf32>
      %40 = arith.subf %4, %39 : vector<8x256xf32>
      %41 = arith.mulf %40, %40 : vector<8x256xf32>
      %cst_22 = arith.constant dense<0.000000e+00> : vector<256xf32>
      %42 = vector.multi_reduction <add>, %41, %cst_22 [0] : vector<8x256xf32> to vector<256xf32>
      %43 = vector.shape_cast %42 : vector<256xf32> to vector<1x256xf32>
      %44 = tpu.concatenate %25, %31, %37, %43 in 0 : vector<1x256xf32>, vector<1x256xf32>, vector<1x256xf32>, vector<1x256xf32> -> vector<4x256xf32>
      %45 = math.sqrt %44 : vector<4x256xf32>
      %46 = vector.broadcast %15 : vector<4x1xf32> to vector<4x256xf32>
      %47 = arith.addf %46, %45 : vector<4x256xf32>
      %48 = tpu.reciprocal %47 {approx = true} : vector<4x256xf32> -> vector<4x256xf32>
      %49 = arith.mulf %47, %48 : vector<4x256xf32>
      %cst_23 = arith.constant 2.000000e+00 : f32
      %50 = vector.broadcast %cst_23 : f32 to vector<4x256xf32>
      %51 = arith.subf %50, %49 : vector<4x256xf32>
      %52 = arith.mulf %48, %51 : vector<4x256xf32>
      %53 = vector.broadcast %17 : vector<4x1xf32> to vector<4x256xf32>
      %54 = arith.mulf %53, %52 : vector<4x256xf32>
      %55 = math.log1p %54 : vector<4x256xf32>
      %cst_24 = arith.constant 7.000000e+00 : f32
      %56 = vector.broadcast %cst_24 : f32 to vector<4x256xf32>
      %57 = arith.mulf %56, %55 : vector<4x256xf32>
      %58 = arith.addf %13, %57 : vector<4x256xf32>
      %59 = vector.broadcast %19 : vector<4x1xf32> to vector<4x256xf32>
      %60 = arith.mulf %59, %52 : vector<4x256xf32>
      %61 = arith.mulf %60, %52 : vector<4x256xf32>
      %62 = math.log1p %61 : vector<4x256xf32>
      %63 = arith.addf %58, %62 : vector<4x256xf32>
      %64 = vector.extract_strided_slice %54 {offsets = [0, 0], sizes = [1, 256], strides = [1, 1]} : vector<4x256xf32> to vector<1x256xf32>
      %65 = vector.broadcast %64 : vector<1x256xf32> to vector<8x256xf32>
      %66 = arith.mulf %65, %22 : vector<8x256xf32>
      %67 = arith.addf %4, %66 : vector<8x256xf32>
      %68 = vector.extract_strided_slice %54 {offsets = [1, 0], sizes = [1, 256], strides = [1, 1]} : vector<4x256xf32> to vector<1x256xf32>
      %69 = vector.broadcast %68 : vector<1x256xf32> to vector<8x256xf32>
      %70 = arith.mulf %69, %28 : vector<8x256xf32>
      %71 = arith.addf %4, %70 : vector<8x256xf32>
      %72 = vector.extract_strided_slice %54 {offsets = [2, 0], sizes = [1, 256], strides = [1, 1]} : vector<4x256xf32> to vector<1x256xf32>
      %73 = vector.broadcast %72 : vector<1x256xf32> to vector<8x256xf32>
      %74 = arith.mulf %73, %34 : vector<8x256xf32>
      %75 = arith.addf %4, %74 : vector<8x256xf32>
      %76 = vector.extract_strided_slice %54 {offsets = [3, 0], sizes = [1, 256], strides = [1, 1]} : vector<4x256xf32> to vector<1x256xf32>
      %77 = vector.broadcast %76 : vector<1x256xf32> to vector<8x256xf32>
      %78 = arith.mulf %77, %40 : vector<8x256xf32>
      %79 = arith.addf %4, %78 : vector<8x256xf32>
      %c1_25 = arith.constant 1 : index
      %c0_26 = arith.constant 0 : index
      %c0_27 = arith.constant 0 : index
      %80 = vector.load %arg3[%c1_25, %c0_26, %c0_27] : memref<6x4x1xf32, #tpu.memory_space<vmem>>, vector<1x4x1xf32>
      %81 = vector.shape_cast %80 : vector<1x4x1xf32> to vector<4x1xf32>
      %c1_28 = arith.constant 1 : index
      %c0_29 = arith.constant 0 : index
      %c0_30 = arith.constant 0 : index
      %82 = vector.load %arg4[%c1_28, %c0_29, %c0_30] : memref<6x4x1xf32, #tpu.memory_space<vmem>>, vector<1x4x1xf32>
      %83 = vector.shape_cast %82 : vector<1x4x1xf32> to vector<4x1xf32>
      %c1_31 = arith.constant 1 : index
      %c0_32 = arith.constant 0 : index
      %c0_33 = arith.constant 0 : index
      %84 = vector.load %arg5[%c1_31, %c0_32, %c0_33] : memref<6x4x1xf32, #tpu.memory_space<vmem>>, vector<1x4x1xf32>
      %85 = vector.shape_cast %84 : vector<1x4x1xf32> to vector<4x1xf32>
      %86 = vector.extract_strided_slice %6 {offsets = [0, 1], sizes = [8, 1], strides = [1, 1]} : vector<8x6xf32> to vector<8x1xf32>
      %87 = vector.broadcast %86 : vector<8x1xf32> to vector<8x256xf32>
      %88 = arith.subf %67, %87 : vector<8x256xf32>
      %89 = arith.mulf %88, %88 : vector<8x256xf32>
      %cst_34 = arith.constant dense<0.000000e+00> : vector<256xf32>
      %90 = vector.multi_reduction <add>, %89, %cst_34 [0] : vector<8x256xf32> to vector<256xf32>
      %91 = vector.shape_cast %90 : vector<256xf32> to vector<1x256xf32>
      %92 = vector.extract_strided_slice %8 {offsets = [0, 1], sizes = [8, 1], strides = [1, 1]} : vector<8x6xf32> to vector<8x1xf32>
      %93 = vector.broadcast %92 : vector<8x1xf32> to vector<8x256xf32>
      %94 = arith.subf %71, %93 : vector<8x256xf32>
      %95 = arith.mulf %94, %94 : vector<8x256xf32>
      %cst_35 = arith.constant dense<0.000000e+00> : vector<256xf32>
      %96 = vector.multi_reduction <add>, %95, %cst_35 [0] : vector<8x256xf32> to vector<256xf32>
      %97 = vector.shape_cast %96 : vector<256xf32> to vector<1x256xf32>
      %98 = vector.extract_strided_slice %10 {offsets = [0, 1], sizes = [8, 1], strides = [1, 1]} : vector<8x6xf32> to vector<8x1xf32>
      %99 = vector.broadcast %98 : vector<8x1xf32> to vector<8x256xf32>
      %100 = arith.subf %75, %99 : vector<8x256xf32>
      %101 = arith.mulf %100, %100 : vector<8x256xf32>
      %cst_36 = arith.constant dense<0.000000e+00> : vector<256xf32>
      %102 = vector.multi_reduction <add>, %101, %cst_36 [0] : vector<8x256xf32> to vector<256xf32>
      %103 = vector.shape_cast %102 : vector<256xf32> to vector<1x256xf32>
      %104 = vector.extract_strided_slice %12 {offsets = [0, 1], sizes = [8, 1], strides = [1, 1]} : vector<8x6xf32> to vector<8x1xf32>
      %105 = vector.broadcast %104 : vector<8x1xf32> to vector<8x256xf32>
      %106 = arith.subf %79, %105 : vector<8x256xf32>
      %107 = arith.mulf %106, %106 : vector<8x256xf32>
      %cst_37 = arith.constant dense<0.000000e+00> : vector<256xf32>
      %108 = vector.multi_reduction <add>, %107, %cst_37 [0] : vector<8x256xf32> to vector<256xf32>
      %109 = vector.shape_cast %108 : vector<256xf32> to vector<1x256xf32>
      %110 = tpu.concatenate %91, %97, %103, %109 in 0 : vector<1x256xf32>, vector<1x256xf32>, vector<1x256xf32>, vector<1x256xf32> -> vector<4x256xf32>
      %111 = math.sqrt %110 : vector<4x256xf32>
      %112 = vector.broadcast %81 : vector<4x1xf32> to vector<4x256xf32>
      %113 = arith.addf %112, %111 : vector<4x256xf32>
      %114 = tpu.reciprocal %113 {approx = true} : vector<4x256xf32> -> vector<4x256xf32>
      %115 = arith.mulf %113, %114 : vector<4x256xf32>
      %cst_38 = arith.constant 2.000000e+00 : f32
      %116 = vector.broadcast %cst_38 : f32 to vector<4x256xf32>
      %117 = arith.subf %116, %115 : vector<4x256xf32>
      %118 = arith.mulf %114, %117 : vector<4x256xf32>
      %119 = vector.broadcast %83 : vector<4x1xf32> to vector<4x256xf32>
      %120 = arith.mulf %119, %118 : vector<4x256xf32>
      %121 = math.log1p %120 : vector<4x256xf32>
      %cst_39 = arith.constant 7.000000e+00 : f32
      %122 = vector.broadcast %cst_39 : f32 to vector<4x256xf32>
      %123 = arith.mulf %122, %121 : vector<4x256xf32>
      %124 = arith.addf %63, %123 : vector<4x256xf32>
      %125 = vector.broadcast %85 : vector<4x1xf32> to vector<4x256xf32>
      %126 = arith.mulf %125, %118 : vector<4x256xf32>
      %127 = arith.mulf %126, %118 : vector<4x256xf32>
      %128 = math.log1p %127 : vector<4x256xf32>
      %129 = arith.addf %124, %128 : vector<4x256xf32>
      %130 = vector.extract_strided_slice %120 {offsets = [0, 0], sizes = [1, 256], strides = [1, 1]} : vector<4x256xf32> to vector<1x256xf32>
      %131 = vector.broadcast %130 : vector<1x256xf32> to vector<8x256xf32>
      %132 = arith.mulf %131, %88 : vector<8x256xf32>
      %133 = arith.addf %67, %132 : vector<8x256xf32>
      %134 = vector.extract_strided_slice %120 {offsets = [1, 0], sizes = [1, 256], strides = [1, 1]} : vector<4x256xf32> to vector<1x256xf32>
      %135 = vector.broadcast %134 : vector<1x256xf32> to vector<8x256xf32>
      %136 = arith.mulf %135, %94 : vector<8x256xf32>
      %137 = arith.addf %71, %136 : vector<8x256xf32>
      %138 = vector.extract_strided_slice %120 {offsets = [2, 0], sizes = [1, 256], strides = [1, 1]} : vector<4x256xf32> to vector<1x256xf32>
      %139 = vector.broadcast %138 : vector<1x256xf32> to vector<8x256xf32>
      %140 = arith.mulf %139, %100 : vector<8x256xf32>
      %141 = arith.addf %75, %140 : vector<8x256xf32>
      %142 = vector.extract_strided_slice %120 {offsets = [3, 0], sizes = [1, 256], strides = [1, 1]} : vector<4x256xf32> to vector<1x256xf32>
      %143 = vector.broadcast %142 : vector<1x256xf32> to vector<8x256xf32>
      %144 = arith.mulf %143, %106 : vector<8x256xf32>
      %145 = arith.addf %79, %144 : vector<8x256xf32>
      %c2_40 = arith.constant 2 : index
      %c0_41 = arith.constant 0 : index
      %c0_42 = arith.constant 0 : index
      %146 = vector.load %arg3[%c2_40, %c0_41, %c0_42] : memref<6x4x1xf32, #tpu.memory_space<vmem>>, vector<1x4x1xf32>
      %147 = vector.shape_cast %146 : vector<1x4x1xf32> to vector<4x1xf32>
      %c2_43 = arith.constant 2 : index
      %c0_44 = arith.constant 0 : index
      %c0_45 = arith.constant 0 : index
      %148 = vector.load %arg4[%c2_43, %c0_44, %c0_45] : memref<6x4x1xf32, #tpu.memory_space<vmem>>, vector<1x4x1xf32>
      %149 = vector.shape_cast %148 : vector<1x4x1xf32> to vector<4x1xf32>
      %c2_46 = arith.constant 2 : index
      %c0_47 = arith.constant 0 : index
      %c0_48 = arith.constant 0 : index
      %150 = vector.load %arg5[%c2_46, %c0_47, %c0_48] : memref<6x4x1xf32, #tpu.memory_space<vmem>>, vector<1x4x1xf32>
      %151 = vector.shape_cast %150 : vector<1x4x1xf32> to vector<4x1xf32>
      %152 = vector.extract_strided_slice %6 {offsets = [0, 2], sizes = [8, 1], strides = [1, 1]} : vector<8x6xf32> to vector<8x1xf32>
      %153 = vector.broadcast %152 : vector<8x1xf32> to vector<8x256xf32>
      %154 = arith.subf %133, %153 : vector<8x256xf32>
      %155 = arith.mulf %154, %154 : vector<8x256xf32>
      %cst_49 = arith.constant dense<0.000000e+00> : vector<256xf32>
      %156 = vector.multi_reduction <add>, %155, %cst_49 [0] : vector<8x256xf32> to vector<256xf32>
      %157 = vector.shape_cast %156 : vector<256xf32> to vector<1x256xf32>
      %158 = vector.extract_strided_slice %8 {offsets = [0, 2], sizes = [8, 1], strides = [1, 1]} : vector<8x6xf32> to vector<8x1xf32>
      %159 = vector.broadcast %158 : vector<8x1xf32> to vector<8x256xf32>
      %160 = arith.subf %137, %159 : vector<8x256xf32>
      %161 = arith.mulf %160, %160 : vector<8x256xf32>
      %cst_50 = arith.constant dense<0.000000e+00> : vector<256xf32>
      %162 = vector.multi_reduction <add>, %161, %cst_50 [0] : vector<8x256xf32> to vector<256xf32>
      %163 = vector.shape_cast %162 : vector<256xf32> to vector<1x256xf32>
      %164 = vector.extract_strided_slice %10 {offsets = [0, 2], sizes = [8, 1], strides = [1, 1]} : vector<8x6xf32> to vector<8x1xf32>
      %165 = vector.broadcast %164 : vector<8x1xf32> to vector<8x256xf32>
      %166 = arith.subf %141, %165 : vector<8x256xf32>
      %167 = arith.mulf %166, %166 : vector<8x256xf32>
      %cst_51 = arith.constant dense<0.000000e+00> : vector<256xf32>
      %168 = vector.multi_reduction <add>, %167, %cst_51 [0] : vector<8x256xf32> to vector<256xf32>
      %169 = vector.shape_cast %168 : vector<256xf32> to vector<1x256xf32>
      %170 = vector.extract_strided_slice %12 {offsets = [0, 2], sizes = [8, 1], strides = [1, 1]} : vector<8x6xf32> to vector<8x1xf32>
      %171 = vector.broadcast %170 : vector<8x1xf32> to vector<8x256xf32>
      %172 = arith.subf %145, %171 : vector<8x256xf32>
      %173 = arith.mulf %172, %172 : vector<8x256xf32>
      %cst_52 = arith.constant dense<0.000000e+00> : vector<256xf32>
      %174 = vector.multi_reduction <add>, %173, %cst_52 [0] : vector<8x256xf32> to vector<256xf32>
      %175 = vector.shape_cast %174 : vector<256xf32> to vector<1x256xf32>
      %176 = tpu.concatenate %157, %163, %169, %175 in 0 : vector<1x256xf32>, vector<1x256xf32>, vector<1x256xf32>, vector<1x256xf32> -> vector<4x256xf32>
      %177 = math.sqrt %176 : vector<4x256xf32>
      %178 = vector.broadcast %147 : vector<4x1xf32> to vector<4x256xf32>
      %179 = arith.addf %178, %177 : vector<4x256xf32>
      %180 = tpu.reciprocal %179 {approx = true} : vector<4x256xf32> -> vector<4x256xf32>
      %181 = arith.mulf %179, %180 : vector<4x256xf32>
      %cst_53 = arith.constant 2.000000e+00 : f32
      %182 = vector.broadcast %cst_53 : f32 to vector<4x256xf32>
      %183 = arith.subf %182, %181 : vector<4x256xf32>
      %184 = arith.mulf %180, %183 : vector<4x256xf32>
      %185 = vector.broadcast %149 : vector<4x1xf32> to vector<4x256xf32>
      %186 = arith.mulf %185, %184 : vector<4x256xf32>
      %187 = math.log1p %186 : vector<4x256xf32>
      %cst_54 = arith.constant 7.000000e+00 : f32
      %188 = vector.broadcast %cst_54 : f32 to vector<4x256xf32>
      %189 = arith.mulf %188, %187 : vector<4x256xf32>
      %190 = arith.addf %129, %189 : vector<4x256xf32>
      %191 = vector.broadcast %151 : vector<4x1xf32> to vector<4x256xf32>
      %192 = arith.mulf %191, %184 : vector<4x256xf32>
      %193 = arith.mulf %192, %184 : vector<4x256xf32>
      %194 = math.log1p %193 : vector<4x256xf32>
      %195 = arith.addf %190, %194 : vector<4x256xf32>
      %196 = vector.extract_strided_slice %186 {offsets = [0, 0], sizes = [1, 256], strides = [1, 1]} : vector<4x256xf32> to vector<1x256xf32>
      %197 = vector.broadcast %196 : vector<1x256xf32> to vector<8x256xf32>
      %198 = arith.mulf %197, %154 : vector<8x256xf32>
      %199 = arith.addf %133, %198 : vector<8x256xf32>
      %200 = vector.extract_strided_slice %186 {offsets = [1, 0], sizes = [1, 256], strides = [1, 1]} : vector<4x256xf32> to vector<1x256xf32>
      %201 = vector.broadcast %200 : vector<1x256xf32> to vector<8x256xf32>
      %202 = arith.mulf %201, %160 : vector<8x256xf32>
      %203 = arith.addf %137, %202 : vector<8x256xf32>
      %204 = vector.extract_strided_slice %186 {offsets = [2, 0], sizes = [1, 256], strides = [1, 1]} : vector<4x256xf32> to vector<1x256xf32>
      %205 = vector.broadcast %204 : vector<1x256xf32> to vector<8x256xf32>
      %206 = arith.mulf %205, %166 : vector<8x256xf32>
      %207 = arith.addf %141, %206 : vector<8x256xf32>
      %208 = vector.extract_strided_slice %186 {offsets = [3, 0], sizes = [1, 256], strides = [1, 1]} : vector<4x256xf32> to vector<1x256xf32>
      %209 = vector.broadcast %208 : vector<1x256xf32> to vector<8x256xf32>
      %210 = arith.mulf %209, %172 : vector<8x256xf32>
      %211 = arith.addf %145, %210 : vector<8x256xf32>
      %c3_55 = arith.constant 3 : index
      %c0_56 = arith.constant 0 : index
      %c0_57 = arith.constant 0 : index
      %212 = vector.load %arg3[%c3_55, %c0_56, %c0_57] : memref<6x4x1xf32, #tpu.memory_space<vmem>>, vector<1x4x1xf32>
      %213 = vector.shape_cast %212 : vector<1x4x1xf32> to vector<4x1xf32>
      %c3_58 = arith.constant 3 : index
      %c0_59 = arith.constant 0 : index
      %c0_60 = arith.constant 0 : index
      %214 = vector.load %arg4[%c3_58, %c0_59, %c0_60] : memref<6x4x1xf32, #tpu.memory_space<vmem>>, vector<1x4x1xf32>
      %215 = vector.shape_cast %214 : vector<1x4x1xf32> to vector<4x1xf32>
      %c3_61 = arith.constant 3 : index
      %c0_62 = arith.constant 0 : index
      %c0_63 = arith.constant 0 : index
      %216 = vector.load %arg5[%c3_61, %c0_62, %c0_63] : memref<6x4x1xf32, #tpu.memory_space<vmem>>, vector<1x4x1xf32>
      %217 = vector.shape_cast %216 : vector<1x4x1xf32> to vector<4x1xf32>
      %218 = vector.extract_strided_slice %6 {offsets = [0, 3], sizes = [8, 1], strides = [1, 1]} : vector<8x6xf32> to vector<8x1xf32>
      %219 = vector.broadcast %218 : vector<8x1xf32> to vector<8x256xf32>
      %220 = arith.subf %199, %219 : vector<8x256xf32>
      %221 = arith.mulf %220, %220 : vector<8x256xf32>
      %cst_64 = arith.constant dense<0.000000e+00> : vector<256xf32>
      %222 = vector.multi_reduction <add>, %221, %cst_64 [0] : vector<8x256xf32> to vector<256xf32>
      %223 = vector.shape_cast %222 : vector<256xf32> to vector<1x256xf32>
      %224 = vector.extract_strided_slice %8 {offsets = [0, 3], sizes = [8, 1], strides = [1, 1]} : vector<8x6xf32> to vector<8x1xf32>
      %225 = vector.broadcast %224 : vector<8x1xf32> to vector<8x256xf32>
      %226 = arith.subf %203, %225 : vector<8x256xf32>
      %227 = arith.mulf %226, %226 : vector<8x256xf32>
      %cst_65 = arith.constant dense<0.000000e+00> : vector<256xf32>
      %228 = vector.multi_reduction <add>, %227, %cst_65 [0] : vector<8x256xf32> to vector<256xf32>
      %229 = vector.shape_cast %228 : vector<256xf32> to vector<1x256xf32>
      %230 = vector.extract_strided_slice %10 {offsets = [0, 3], sizes = [8, 1], strides = [1, 1]} : vector<8x6xf32> to vector<8x1xf32>
      %231 = vector.broadcast %230 : vector<8x1xf32> to vector<8x256xf32>
      %232 = arith.subf %207, %231 : vector<8x256xf32>
      %233 = arith.mulf %232, %232 : vector<8x256xf32>
      %cst_66 = arith.constant dense<0.000000e+00> : vector<256xf32>
      %234 = vector.multi_reduction <add>, %233, %cst_66 [0] : vector<8x256xf32> to vector<256xf32>
      %235 = vector.shape_cast %234 : vector<256xf32> to vector<1x256xf32>
      %236 = vector.extract_strided_slice %12 {offsets = [0, 3], sizes = [8, 1], strides = [1, 1]} : vector<8x6xf32> to vector<8x1xf32>
      %237 = vector.broadcast %236 : vector<8x1xf32> to vector<8x256xf32>
      %238 = arith.subf %211, %237 : vector<8x256xf32>
      %239 = arith.mulf %238, %238 : vector<8x256xf32>
      %cst_67 = arith.constant dense<0.000000e+00> : vector<256xf32>
      %240 = vector.multi_reduction <add>, %239, %cst_67 [0] : vector<8x256xf32> to vector<256xf32>
      %241 = vector.shape_cast %240 : vector<256xf32> to vector<1x256xf32>
      %242 = tpu.concatenate %223, %229, %235, %241 in 0 : vector<1x256xf32>, vector<1x256xf32>, vector<1x256xf32>, vector<1x256xf32> -> vector<4x256xf32>
      %243 = math.sqrt %242 : vector<4x256xf32>
      %244 = vector.broadcast %213 : vector<4x1xf32> to vector<4x256xf32>
      %245 = arith.addf %244, %243 : vector<4x256xf32>
      %246 = tpu.reciprocal %245 {approx = true} : vector<4x256xf32> -> vector<4x256xf32>
      %247 = arith.mulf %245, %246 : vector<4x256xf32>
      %cst_68 = arith.constant 2.000000e+00 : f32
      %248 = vector.broadcast %cst_68 : f32 to vector<4x256xf32>
      %249 = arith.subf %248, %247 : vector<4x256xf32>
      %250 = arith.mulf %246, %249 : vector<4x256xf32>
      %251 = vector.broadcast %215 : vector<4x1xf32> to vector<4x256xf32>
      %252 = arith.mulf %251, %250 : vector<4x256xf32>
      %253 = math.log1p %252 : vector<4x256xf32>
      %cst_69 = arith.constant 7.000000e+00 : f32
      %254 = vector.broadcast %cst_69 : f32 to vector<4x256xf32>
      %255 = arith.mulf %254, %253 : vector<4x256xf32>
      %256 = arith.addf %195, %255 : vector<4x256xf32>
      %257 = vector.broadcast %217 : vector<4x1xf32> to vector<4x256xf32>
      %258 = arith.mulf %257, %250 : vector<4x256xf32>
      %259 = arith.mulf %258, %250 : vector<4x256xf32>
      %260 = math.log1p %259 : vector<4x256xf32>
      %261 = arith.addf %256, %260 : vector<4x256xf32>
      %262 = vector.extract_strided_slice %252 {offsets = [0, 0], sizes = [1, 256], strides = [1, 1]} : vector<4x256xf32> to vector<1x256xf32>
      %263 = vector.broadcast %262 : vector<1x256xf32> to vector<8x256xf32>
      %264 = arith.mulf %263, %220 : vector<8x256xf32>
      %265 = arith.addf %199, %264 : vector<8x256xf32>
      %266 = vector.extract_strided_slice %252 {offsets = [1, 0], sizes = [1, 256], strides = [1, 1]} : vector<4x256xf32> to vector<1x256xf32>
      %267 = vector.broadcast %266 : vector<1x256xf32> to vector<8x256xf32>
      %268 = arith.mulf %267, %226 : vector<8x256xf32>
      %269 = arith.addf %203, %268 : vector<8x256xf32>
      %270 = vector.extract_strided_slice %252 {offsets = [2, 0], sizes = [1, 256], strides = [1, 1]} : vector<4x256xf32> to vector<1x256xf32>
      %271 = vector.broadcast %270 : vector<1x256xf32> to vector<8x256xf32>
      %272 = arith.mulf %271, %232 : vector<8x256xf32>
      %273 = arith.addf %207, %272 : vector<8x256xf32>
      %274 = vector.extract_strided_slice %252 {offsets = [3, 0], sizes = [1, 256], strides = [1, 1]} : vector<4x256xf32> to vector<1x256xf32>
      %275 = vector.broadcast %274 : vector<1x256xf32> to vector<8x256xf32>
      %276 = arith.mulf %275, %238 : vector<8x256xf32>
      %277 = arith.addf %211, %276 : vector<8x256xf32>
      %c4 = arith.constant 4 : index
      %c0_70 = arith.constant 0 : index
      %c0_71 = arith.constant 0 : index
      %278 = vector.load %arg3[%c4, %c0_70, %c0_71] : memref<6x4x1xf32, #tpu.memory_space<vmem>>, vector<1x4x1xf32>
      %279 = vector.shape_cast %278 : vector<1x4x1xf32> to vector<4x1xf32>
      %c4_72 = arith.constant 4 : index
      %c0_73 = arith.constant 0 : index
      %c0_74 = arith.constant 0 : index
      %280 = vector.load %arg4[%c4_72, %c0_73, %c0_74] : memref<6x4x1xf32, #tpu.memory_space<vmem>>, vector<1x4x1xf32>
      %281 = vector.shape_cast %280 : vector<1x4x1xf32> to vector<4x1xf32>
      %c4_75 = arith.constant 4 : index
      %c0_76 = arith.constant 0 : index
      %c0_77 = arith.constant 0 : index
      %282 = vector.load %arg5[%c4_75, %c0_76, %c0_77] : memref<6x4x1xf32, #tpu.memory_space<vmem>>, vector<1x4x1xf32>
      %283 = vector.shape_cast %282 : vector<1x4x1xf32> to vector<4x1xf32>
      %284 = vector.extract_strided_slice %6 {offsets = [0, 4], sizes = [8, 1], strides = [1, 1]} : vector<8x6xf32> to vector<8x1xf32>
      %285 = vector.broadcast %284 : vector<8x1xf32> to vector<8x256xf32>
      %286 = arith.subf %265, %285 : vector<8x256xf32>
      %287 = arith.mulf %286, %286 : vector<8x256xf32>
      %cst_78 = arith.constant dense<0.000000e+00> : vector<256xf32>
      %288 = vector.multi_reduction <add>, %287, %cst_78 [0] : vector<8x256xf32> to vector<256xf32>
      %289 = vector.shape_cast %288 : vector<256xf32> to vector<1x256xf32>
      %290 = vector.extract_strided_slice %8 {offsets = [0, 4], sizes = [8, 1], strides = [1, 1]} : vector<8x6xf32> to vector<8x1xf32>
      %291 = vector.broadcast %290 : vector<8x1xf32> to vector<8x256xf32>
      %292 = arith.subf %269, %291 : vector<8x256xf32>
      %293 = arith.mulf %292, %292 : vector<8x256xf32>
      %cst_79 = arith.constant dense<0.000000e+00> : vector<256xf32>
      %294 = vector.multi_reduction <add>, %293, %cst_79 [0] : vector<8x256xf32> to vector<256xf32>
      %295 = vector.shape_cast %294 : vector<256xf32> to vector<1x256xf32>
      %296 = vector.extract_strided_slice %10 {offsets = [0, 4], sizes = [8, 1], strides = [1, 1]} : vector<8x6xf32> to vector<8x1xf32>
      %297 = vector.broadcast %296 : vector<8x1xf32> to vector<8x256xf32>
      %298 = arith.subf %273, %297 : vector<8x256xf32>
      %299 = arith.mulf %298, %298 : vector<8x256xf32>
      %cst_80 = arith.constant dense<0.000000e+00> : vector<256xf32>
      %300 = vector.multi_reduction <add>, %299, %cst_80 [0] : vector<8x256xf32> to vector<256xf32>
      %301 = vector.shape_cast %300 : vector<256xf32> to vector<1x256xf32>
      %302 = vector.extract_strided_slice %12 {offsets = [0, 4], sizes = [8, 1], strides = [1, 1]} : vector<8x6xf32> to vector<8x1xf32>
      %303 = vector.broadcast %302 : vector<8x1xf32> to vector<8x256xf32>
      %304 = arith.subf %277, %303 : vector<8x256xf32>
      %305 = arith.mulf %304, %304 : vector<8x256xf32>
      %cst_81 = arith.constant dense<0.000000e+00> : vector<256xf32>
      %306 = vector.multi_reduction <add>, %305, %cst_81 [0] : vector<8x256xf32> to vector<256xf32>
      %307 = vector.shape_cast %306 : vector<256xf32> to vector<1x256xf32>
      %308 = tpu.concatenate %289, %295, %301, %307 in 0 : vector<1x256xf32>, vector<1x256xf32>, vector<1x256xf32>, vector<1x256xf32> -> vector<4x256xf32>
      %309 = math.sqrt %308 : vector<4x256xf32>
      %310 = vector.broadcast %279 : vector<4x1xf32> to vector<4x256xf32>
      %311 = arith.addf %310, %309 : vector<4x256xf32>
      %312 = tpu.reciprocal %311 {approx = true} : vector<4x256xf32> -> vector<4x256xf32>
      %313 = arith.mulf %311, %312 : vector<4x256xf32>
      %cst_82 = arith.constant 2.000000e+00 : f32
      %314 = vector.broadcast %cst_82 : f32 to vector<4x256xf32>
      %315 = arith.subf %314, %313 : vector<4x256xf32>
      %316 = arith.mulf %312, %315 : vector<4x256xf32>
      %317 = vector.broadcast %281 : vector<4x1xf32> to vector<4x256xf32>
      %318 = arith.mulf %317, %316 : vector<4x256xf32>
      %319 = math.log1p %318 : vector<4x256xf32>
      %cst_83 = arith.constant 7.000000e+00 : f32
      %320 = vector.broadcast %cst_83 : f32 to vector<4x256xf32>
      %321 = arith.mulf %320, %319 : vector<4x256xf32>
      %322 = arith.addf %261, %321 : vector<4x256xf32>
      %323 = vector.broadcast %283 : vector<4x1xf32> to vector<4x256xf32>
      %324 = arith.mulf %323, %316 : vector<4x256xf32>
      %325 = arith.mulf %324, %316 : vector<4x256xf32>
      %326 = math.log1p %325 : vector<4x256xf32>
      %327 = arith.addf %322, %326 : vector<4x256xf32>
      %328 = vector.extract_strided_slice %318 {offsets = [0, 0], sizes = [1, 256], strides = [1, 1]} : vector<4x256xf32> to vector<1x256xf32>
      %329 = vector.broadcast %328 : vector<1x256xf32> to vector<8x256xf32>
      %330 = arith.mulf %329, %286 : vector<8x256xf32>
      %331 = arith.addf %265, %330 : vector<8x256xf32>
      %332 = vector.extract_strided_slice %318 {offsets = [1, 0], sizes = [1, 256], strides = [1, 1]} : vector<4x256xf32> to vector<1x256xf32>
      %333 = vector.broadcast %332 : vector<1x256xf32> to vector<8x256xf32>
      %334 = arith.mulf %333, %292 : vector<8x256xf32>
      %335 = arith.addf %269, %334 : vector<8x256xf32>
      %336 = vector.extract_strided_slice %318 {offsets = [2, 0], sizes = [1, 256], strides = [1, 1]} : vector<4x256xf32> to vector<1x256xf32>
      %337 = vector.broadcast %336 : vector<1x256xf32> to vector<8x256xf32>
      %338 = arith.mulf %337, %298 : vector<8x256xf32>
      %339 = arith.addf %273, %338 : vector<8x256xf32>
      %340 = vector.extract_strided_slice %318 {offsets = [3, 0], sizes = [1, 256], strides = [1, 1]} : vector<4x256xf32> to vector<1x256xf32>
      %341 = vector.broadcast %340 : vector<1x256xf32> to vector<8x256xf32>
      %342 = arith.mulf %341, %304 : vector<8x256xf32>
      %343 = arith.addf %277, %342 : vector<8x256xf32>
      %c5 = arith.constant 5 : index
      %c0_84 = arith.constant 0 : index
      %c0_85 = arith.constant 0 : index
      %344 = vector.load %arg3[%c5, %c0_84, %c0_85] : memref<6x4x1xf32, #tpu.memory_space<vmem>>, vector<1x4x1xf32>
      %345 = vector.shape_cast %344 : vector<1x4x1xf32> to vector<4x1xf32>
      %c5_86 = arith.constant 5 : index
      %c0_87 = arith.constant 0 : index
      %c0_88 = arith.constant 0 : index
      %346 = vector.load %arg4[%c5_86, %c0_87, %c0_88] : memref<6x4x1xf32, #tpu.memory_space<vmem>>, vector<1x4x1xf32>
      %347 = vector.shape_cast %346 : vector<1x4x1xf32> to vector<4x1xf32>
      %c5_89 = arith.constant 5 : index
      %c0_90 = arith.constant 0 : index
      %c0_91 = arith.constant 0 : index
      %348 = vector.load %arg5[%c5_89, %c0_90, %c0_91] : memref<6x4x1xf32, #tpu.memory_space<vmem>>, vector<1x4x1xf32>
      %349 = vector.shape_cast %348 : vector<1x4x1xf32> to vector<4x1xf32>
      %350 = vector.extract_strided_slice %6 {offsets = [0, 5], sizes = [8, 1], strides = [1, 1]} : vector<8x6xf32> to vector<8x1xf32>
      %351 = vector.broadcast %350 : vector<8x1xf32> to vector<8x256xf32>
      %352 = arith.subf %331, %351 : vector<8x256xf32>
      %353 = arith.mulf %352, %352 : vector<8x256xf32>
      %cst_92 = arith.constant dense<0.000000e+00> : vector<256xf32>
      %354 = vector.multi_reduction <add>, %353, %cst_92 [0] : vector<8x256xf32> to vector<256xf32>
      %355 = vector.shape_cast %354 : vector<256xf32> to vector<1x256xf32>
      %356 = vector.extract_strided_slice %8 {offsets = [0, 5], sizes = [8, 1], strides = [1, 1]} : vector<8x6xf32> to vector<8x1xf32>
      %357 = vector.broadcast %356 : vector<8x1xf32> to vector<8x256xf32>
      %358 = arith.subf %335, %357 : vector<8x256xf32>
      %359 = arith.mulf %358, %358 : vector<8x256xf32>
      %cst_93 = arith.constant dense<0.000000e+00> : vector<256xf32>
      %360 = vector.multi_reduction <add>, %359, %cst_93 [0] : vector<8x256xf32> to vector<256xf32>
      %361 = vector.shape_cast %360 : vector<256xf32> to vector<1x256xf32>
      %362 = vector.extract_strided_slice %10 {offsets = [0, 5], sizes = [8, 1], strides = [1, 1]} : vector<8x6xf32> to vector<8x1xf32>
      %363 = vector.broadcast %362 : vector<8x1xf32> to vector<8x256xf32>
      %364 = arith.subf %339, %363 : vector<8x256xf32>
      %365 = arith.mulf %364, %364 : vector<8x256xf32>
      %cst_94 = arith.constant dense<0.000000e+00> : vector<256xf32>
      %366 = vector.multi_reduction <add>, %365, %cst_94 [0] : vector<8x256xf32> to vector<256xf32>
      %367 = vector.shape_cast %366 : vector<256xf32> to vector<1x256xf32>
      %368 = vector.extract_strided_slice %12 {offsets = [0, 5], sizes = [8, 1], strides = [1, 1]} : vector<8x6xf32> to vector<8x1xf32>
      %369 = vector.broadcast %368 : vector<8x1xf32> to vector<8x256xf32>
      %370 = arith.subf %343, %369 : vector<8x256xf32>
      %371 = arith.mulf %370, %370 : vector<8x256xf32>
      %cst_95 = arith.constant dense<0.000000e+00> : vector<256xf32>
      %372 = vector.multi_reduction <add>, %371, %cst_95 [0] : vector<8x256xf32> to vector<256xf32>
      %373 = vector.shape_cast %372 : vector<256xf32> to vector<1x256xf32>
      %374 = tpu.concatenate %355, %361, %367, %373 in 0 : vector<1x256xf32>, vector<1x256xf32>, vector<1x256xf32>, vector<1x256xf32> -> vector<4x256xf32>
      %375 = math.sqrt %374 : vector<4x256xf32>
      %376 = vector.broadcast %345 : vector<4x1xf32> to vector<4x256xf32>
      %377 = arith.addf %376, %375 : vector<4x256xf32>
      %378 = tpu.reciprocal %377 {approx = true} : vector<4x256xf32> -> vector<4x256xf32>
      %379 = arith.mulf %377, %378 : vector<4x256xf32>
      %cst_96 = arith.constant 2.000000e+00 : f32
      %380 = vector.broadcast %cst_96 : f32 to vector<4x256xf32>
      %381 = arith.subf %380, %379 : vector<4x256xf32>
      %382 = arith.mulf %378, %381 : vector<4x256xf32>
      %383 = vector.broadcast %347 : vector<4x1xf32> to vector<4x256xf32>
      %384 = arith.mulf %383, %382 : vector<4x256xf32>
      %385 = math.log1p %384 : vector<4x256xf32>
      %cst_97 = arith.constant 7.000000e+00 : f32
      %386 = vector.broadcast %cst_97 : f32 to vector<4x256xf32>
      %387 = arith.mulf %386, %385 : vector<4x256xf32>
      %388 = arith.addf %327, %387 : vector<4x256xf32>
      %389 = vector.broadcast %349 : vector<4x1xf32> to vector<4x256xf32>
      %390 = arith.mulf %389, %382 : vector<4x256xf32>
      %391 = arith.mulf %390, %382 : vector<4x256xf32>
      %392 = math.log1p %391 : vector<4x256xf32>
      %393 = arith.addf %388, %392 : vector<4x256xf32>
      %394 = vector.extract_strided_slice %384 {offsets = [0, 0], sizes = [1, 256], strides = [1, 1]} : vector<4x256xf32> to vector<1x256xf32>
      %395 = vector.broadcast %394 : vector<1x256xf32> to vector<8x256xf32>
      %396 = arith.mulf %395, %352 : vector<8x256xf32>
      %397 = arith.addf %331, %396 : vector<8x256xf32>
      %398 = vector.extract_strided_slice %384 {offsets = [1, 0], sizes = [1, 256], strides = [1, 1]} : vector<4x256xf32> to vector<1x256xf32>
      %399 = vector.broadcast %398 : vector<1x256xf32> to vector<8x256xf32>
      %400 = arith.mulf %399, %358 : vector<8x256xf32>
      %401 = arith.addf %335, %400 : vector<8x256xf32>
      %402 = vector.extract_strided_slice %384 {offsets = [2, 0], sizes = [1, 256], strides = [1, 1]} : vector<4x256xf32> to vector<1x256xf32>
      %403 = vector.broadcast %402 : vector<1x256xf32> to vector<8x256xf32>
      %404 = arith.mulf %403, %364 : vector<8x256xf32>
      %405 = arith.addf %339, %404 : vector<8x256xf32>
      %406 = vector.extract_strided_slice %384 {offsets = [3, 0], sizes = [1, 256], strides = [1, 1]} : vector<4x256xf32> to vector<1x256xf32>
      %407 = vector.broadcast %406 : vector<1x256xf32> to vector<8x256xf32>
      %408 = arith.mulf %407, %370 : vector<8x256xf32>
      %409 = arith.addf %343, %408 : vector<8x256xf32>
      %c0_98 = arith.constant 0 : index
      %c0_99 = arith.constant 0 : index
      %410 = arith.index_cast %2 : i32 to index
      %411 = vector.load %arg6[%c0_98, %c0_99, %410] : memref<4x8x512xf32, #tpu.memory_space<vmem>>, vector<1x8x256xf32>
      %412 = vector.shape_cast %411 : vector<1x8x256xf32> to vector<8x256xf32>
      %413 = vector.shape_cast %397 : vector<8x256xf32> to vector<1x8x256xf32>
      tpu.vector_store %arg6[%c0_98, %c0_99, %410], %413 {strides = array<i32>} : memref<4x8x512xf32, #tpu.memory_space<vmem>>, vector<1x8x256xf32>,
      %c1_100 = arith.constant 1 : index
      %c0_101 = arith.constant 0 : index
      %414 = arith.index_cast %2 : i32 to index
      %415 = vector.load %arg6[%c1_100, %c0_101, %414] : memref<4x8x512xf32, #tpu.memory_space<vmem>>, vector<1x8x256xf32>
      %416 = vector.shape_cast %415 : vector<1x8x256xf32> to vector<8x256xf32>
      %417 = vector.shape_cast %401 : vector<8x256xf32> to vector<1x8x256xf32>
      tpu.vector_store %arg6[%c1_100, %c0_101, %414], %417 {strides = array<i32>} : memref<4x8x512xf32, #tpu.memory_space<vmem>>, vector<1x8x256xf32>,
      %c2_102 = arith.constant 2 : index
      %c0_103 = arith.constant 0 : index
      %418 = arith.index_cast %2 : i32 to index
      %419 = vector.load %arg6[%c2_102, %c0_103, %418] : memref<4x8x512xf32, #tpu.memory_space<vmem>>, vector<1x8x256xf32>
      %420 = vector.shape_cast %419 : vector<1x8x256xf32> to vector<8x256xf32>
      %421 = vector.shape_cast %405 : vector<8x256xf32> to vector<1x8x256xf32>
      tpu.vector_store %arg6[%c2_102, %c0_103, %418], %421 {strides = array<i32>} : memref<4x8x512xf32, #tpu.memory_space<vmem>>, vector<1x8x256xf32>,
      %c3_104 = arith.constant 3 : index
      %c0_105 = arith.constant 0 : index
      %422 = arith.index_cast %2 : i32 to index
      %423 = vector.load %arg6[%c3_104, %c0_105, %422] : memref<4x8x512xf32, #tpu.memory_space<vmem>>, vector<1x8x256xf32>
      %424 = vector.shape_cast %423 : vector<1x8x256xf32> to vector<8x256xf32>
      %425 = vector.shape_cast %409 : vector<8x256xf32> to vector<1x8x256xf32>
      tpu.vector_store %arg6[%c3_104, %c0_105, %422], %425 {strides = array<i32>} : memref<4x8x512xf32, #tpu.memory_space<vmem>>, vector<1x8x256xf32>,
      %c0_106 = arith.constant 0 : index
      %426 = arith.index_cast %2 : i32 to index
      %427 = vector.load %arg7[%c0_106, %426] : memref<4x512xf32, #tpu.memory_space<vmem>>, vector<4x256xf32>
      tpu.vector_store %arg7[%c0_106, %426], %393 {strides = array<i32>} : memref<4x512xf32, #tpu.memory_space<vmem>>, vector<4x256xf32>,
    }
    %c2_i32_0 = arith.constant 2 : i32
    return
  }
  func.func @transform_0(%arg0: i32) -> (i32, i32) {
    %c0_i32 = arith.constant 0 : i32
    %c0_i32_0 = arith.constant 0 : i32
    return %c0_i32, %arg0 : i32, i32
  }
  func.func @transform_1(%arg0: i32) -> (i32, i32, i32) {
    %c0_i32 = arith.constant 0 : i32
    %c0_i32_0 = arith.constant 0 : i32
    %c0_i32_1 = arith.constant 0 : i32
    %c0_i32_2 = arith.constant 0 : i32
    return %c0_i32, %c0_i32_0, %c0_i32_1 : i32, i32, i32
  }
  func.func @transform_2(%arg0: i32) -> (i32, i32, i32) {
    %c0_i32 = arith.constant 0 : i32
    %c0_i32_0 = arith.constant 0 : i32
    %c0_i32_1 = arith.constant 0 : i32
    %c0_i32_2 = arith.constant 0 : i32
    return %c0_i32, %c0_i32_0, %c0_i32_1 : i32, i32, i32
  }
  func.func @transform_3(%arg0: i32) -> (i32, i32, i32) {
    %c0_i32 = arith.constant 0 : i32
    %c0_i32_0 = arith.constant 0 : i32
    %c0_i32_1 = arith.constant 0 : i32
    %c0_i32_2 = arith.constant 0 : i32
    return %c0_i32, %c0_i32_0, %c0_i32_1 : i32, i32, i32
  }
  func.func @transform_4(%arg0: i32) -> (i32, i32, i32) {
    %c0_i32 = arith.constant 0 : i32
    %c0_i32_0 = arith.constant 0 : i32
    %c0_i32_1 = arith.constant 0 : i32
    %c0_i32_2 = arith.constant 0 : i32
    return %c0_i32, %c0_i32_0, %c0_i32_1 : i32, i32, i32
  }
  func.func @transform_5(%arg0: i32) -> (i32, i32, i32) {
    %c0_i32 = arith.constant 0 : i32
    %c0_i32_0 = arith.constant 0 : i32
    %c0_i32_1 = arith.constant 0 : i32
    return %c0_i32, %c0_i32_0, %arg0 : i32, i32, i32
  }
  func.func @transform_6(%arg0: i32) -> (i32, i32) {
    %c0_i32 = arith.constant 0 : i32
    %c0_i32_0 = arith.constant 0 : i32
    return %c0_i32, %arg0 : i32, i32
  }
}

</mosaic_0001>

<bundles_post_ra>
// kernel: batched_normalizing_flow_forward.1
= control target key start
LH: loop header
LB: loop body
LE: loop exit
PB: predicated region body
PF: predicated region fallthrough
CT: control target
= control target key end

     0   :  { %12 = vsyncpa [#allocation4], 0  ;;  %s3205_s0 = inlined_call_operand.vmem [shape: f32[8,1024], index: 0, kind: input, shape index: {}]   ;;  %s3206_s1 = inlined_call_operand.vmem [shape: f32[4,8,6], index: 1, kind: input, shape index: {}]   ;;  %s3207_s2 = inlined_call_operand.vmem [shape: f32[6,4,1], index: 2, kind: input, shape index: {}]   ;;  %s3208_s3 = inlined_call_operand.vmem [shape: f32[6,4,1], index: 3, kind: input, shape index: {}]   ;;  %s3209_s4 = inlined_call_operand.vmem [shape: f32[6,4,1], index: 4, kind: input, shape index: {}]   ;;  %s3210_s5 = inlined_call_operand.vmem [shape: f32[4,8,1024], index: 5, kind: output, shape index: {0}]   ;;  %s3211_s6 = inlined_call_operand.hbm [shape: f32[4,1024], index: 6, kind: output, shape index: {1}]  }
   0x1   :  { %14 = vsyncpa [#allocation4 + $0x1], 0  ;;  %s2108_s21 = smov 0   ;;  %s2110_s22 = smov 0  }
   0x2   :  { %s2112_s23 = smov 0   ;;  %s2114_s24 = smov 0  }
   0x3 LB: > { %s2129_s25 = sadd.s32 4294967295, %s2061_s24   ;;  %s1772_s26 = sadd.s32 4294967294, %s2061_s24   ;;  %s2061_s24 = sphi %s2114_s24, %s3249_s24   ;;  %s2057_s23 = sphi %s2112_s23, %s3248_s23   ;;  %s2053_s22 = sphi %s2110_s22, %s3247_s22   ;;  %s2049_s21 = sphi %s2108_s21, %s3246_s21  }
   0x4   : > { %s2133_s27 = sadd.s32 1, %s2061_s24   ;;  %s137_s28 = sadd.s32 1, %s2057_s23 }
   0x5   : > { %s134_s29 = ssub.s32 %s2061_s24, %s2133_s27  ;;  %p147_p0 = scmp.ne.s32.totalorder %s2057_s23, %s2053_s22 }
   0x6   : > { %p135_p1 = scmp.eq.s32.totalorder %s134_s29, 0  ;;  %p148_p2 = scmp.eq.s32.totalorder %s2129_s25, 1 }
   0x7   : > { %p179_p3 = scmp.ne.s32.totalorder %s2053_s22, %s2049_s21  ;;  %p180_p4 = scmp.eq.s32.totalorder %s1772_s26, 1 }
   0x8   : > { %s2144_s30 = scalar_select %p135_p1, %s2057_s23, %s137_s28  }
   0x9   : > { %p2146_p5 = por %p148_p2, %p147_p0  ;;  %p2150_p6 = por %p180_p4, %p179_p3 }
   0xa   : > { %p1775_p7 = scmp.ge.s32.totalorder %s2061_s24, 1  ;;  %p219_p8 = scmp.lt.s32.totalorder %s2061_s24, 3 }
   0xc   : > { %p220_p9 = pnand %p1775_p7, %p219_p8 }
   0xd   : > { %s2157_s9 = sand.u32 (!%p220_p9), 1, %s2053_s22   ;;  %s1778_s10 = sshll.u32 (!%p220_p9), %s2129_s25, 2 }
   0xe   : > { %223 = sbr.rel (%p220_p9) target bundleno = 611 (0x263), region = 40  ;;  %s1776_s11 = sshll.u32 (!%p220_p9), %s2157_s9, 7 }
   0xf   : > { %s1777_s12 = sshll.u32 (!%p220_p9), %s2157_s9, 4  ;;  %p254_p10 = scmp.lt.s32.totalorder (!%p220_p9), %s1778_s10, 7 }
  0x10   : > { %s2167_s17 = scalar_lea.vmem (!%p220_p9), [#allocation2], %s1776_s11  ;;  %s2169_s18 = scalar_lea.vmem (!%p220_p9), [#allocation3], %s1777_s12 }
  0x11   : > { %s2171_s19 = smov (!%p220_p9), 0  }
  0x13   : > { %s3251_s10 = smov (!%p254_p10, %s1778_s10), 7 }
  0x14   : > { %s1779_s13 = sshll.u32 %s3251_s10, 3 }
  0x15   : > { %s2165_s16 = scalar_lea.vmem %s3205_s0, %s1779_s13 }
  0x16 LB: >> { %v2179_v0 = vld [vmem:[%s3206_s1 + $0x10] sm:$0xff]  ;;  %v2184_v1 = vld [vmem:[%s3206_s1] sm:$0xff]  ;;  %v3212_v2 = vmov 0   ;;  %v2197_v4 = vld [vmem:[%s3206_s1 + $0x18] sm:$0xff]  ;;  %v2068_v7 = vmov 1   ;;  %v2069_v11 = vmov 2   ;;  %s2065_s19 = sphi %s2171_s19, %s266_s19  }
  0x17   : >> { %1875 = vset.pattern.permute.xlu1 %v3212_v2  ;;  %1874 = vset.pattern.permute.xlu0 %v3212_v2  ;;  %v281_v3 = vld [vmem:[%s3207_s2] sm:$0xf]  ;;  %v2202_v5 = vld [vmem:[%s3206_s1 + $0x8] sm:$0xff]  ;;  %v1786_v8 = vld [vmem:[%s3208_s3 + $0x4] sm:$0xf]  ;;  %v2070_v12 = vmov 3  }
  0x18   : >> { %328 = vperm.xlu1 %1875, %v2179_v0   ;;  %286 = vperm.xlu0 %1874, %v2184_v1   ;;  %v282_v6 = vld [vmem:[%s3208_s3] sm:$0xf]  ;;  %v1785_v9 = vld [vmem:[%s3207_s2 + $0x4] sm:$0xf]  ;;  %v1788_v10 = vld [vmem:[%s3207_s2 + $0x8] sm:$0xf] }
  0x19   : >> { %1876 = vset.pattern.permute.xlu2 %v3212_v2  ;;  %v3214_v13 = vmov 4   ;;  %v1795_v14 = vld [vmem:[%s3208_s3 + $0x10] sm:$0xf]  ;;  %v283_v15 = vld [vmem:[%s3209_s4] sm:$0xf]  ;;  %s1780_s12 = sshll.u32 %s2065_s19, 8 }
  0x1a   : >> { %403 = vperm.xlu2 %1876, %v281_v3   ;;  %v1792_v16 = vld [vmem:[%s3208_s3 + $0xc] sm:$0xf]  ;;  %v1794_v17 = vld [vmem:[%s3207_s2 + $0x10] sm:$0xf]  ;;  %v3213_v18 = vmov 5   ;;  %s2256_s13 = sshra.s32 %s1780_s12, 7 }
  0x1b   : >> { %s1781_s14 = sshll.u32 %s2256_s13, 3  ;;  %v1787_v35 = vld [vmem:[%s3209_s4 + $0x4] sm:$0xf]  ;;  %vm368_vm0 = vcmask 1040384   ;;  %vm371_vm1 = vcmask 1041408   ;;  %vm374_vm2 = vcmask 1042432  }
  0x1c   : >> { %s271_s15 = scalar_lea.vmem %s2165_s16, %s1781_s14  ;;  %s3115_s28 = scalar_lea.vmem %s2167_s17, %s1781_s14 [#allocation2] }
  0x1d   : >> { %v2263_v19 = vld [vmem:[%s271_s15] sm:$0xff]  ;;  %v2265_v20 = vld [vmem:[%s271_s15 + $0x8] sm:$0xff]  ;;  %s1810_s14 = sshll.u32 %s2256_s13, 2  ;;  %s266_s19 = sadd.s32 1, %s2065_s19  }
  0x1e   : >> { %s1589_s29 = scalar_lea.vmem %s2169_s18, %s1810_s14 [#allocation3]  ;;  %p263_p11 = scmp.ge.s32.totalorder %s266_s19, 2  }
  0x1f   : > { %s1596_s10 = scalar_lea.sflag (%p263_p11), [#allocation4], %s2157_s9 }
  0x20   : >> { %349 = vperm.xlu1 %1875, %v2197_v4   ;;  %307 = vperm.xlu0 %1874, %v2202_v5  }
  0x22   : >> { %418 = vperm.xlu2 %1876, %v282_v6  }
  0x28   : >> { %1877 = vset.pattern.permute.xlu0 %v2068_v7  ;;  %1878 = vset.pattern.permute.xlu1 %v2068_v7 }
  0x29   : >> { %505 = vperm.xlu0 %1877, %v2184_v1   ;;  %525 = vperm.xlu1 %1878, %v2202_v5  }
  0x2a   : >> { %1879 = vset.pattern.permute.xlu2 %v2068_v7 }
  0x2b   : >> { %545 = vperm.xlu2 %1879, %v2179_v0  }
  0x31   : >> { %1881 = vset.pattern.permute.xlu0 %v3212_v2  ;;  %565 = vperm.xlu1 %1878, %v2197_v4  }
  0x32   : >> { %631 = vperm.xlu0 %1881, %v1786_v8  }
  0x33   : >> { %1880 = vset.pattern.permute.xlu2 %v3212_v2 }
  0x34   : >> { %616 = vperm.xlu2 %1880, %v1785_v9  }
  0x39   : >> { %1882 = vset.pattern.permute.xlu1 %v2069_v11 }
  0x3a   : >> { %829 = vperm.xlu0 %1881, %v1788_v10   ;;  %718 = vperm.xlu1 %1882, %v2184_v1  }
  0x3c   : >> { %1883 = vset.pattern.permute.xlu2 %v2069_v11 }
  0x3d   : >> { %738 = vperm.xlu2 %1883, %v2202_v5  }
  0x42   : >> { %1886 = vset.pattern.permute.xlu0 %v2070_v12  ;;  %758 = vperm.xlu1 %1882, %v2179_v0  }
  0x43   : >> { %951 = vperm.xlu0 %1886, %v2202_v5  }
  0x45   : >> { %778 = vperm.xlu2 %1883, %v2197_v4  }
  0x4a   : >> { %1884 = vset.pattern.permute.xlu1 %v3212_v2 }
  0x4b   : >> { %1890 = vset.pattern.permute.xlu0 %v3214_v13 }
  0x4c   : >> { %1144 = vperm.xlu0 %1890, %v2184_v1  }
  0x4d   : >> { %1885 = vset.pattern.permute.xlu2 %v2070_v12 }
  0x4e   : >> { %931 = vperm.xlu2 %1885, %v2184_v1  }
  0x54   : >> { %1894 = vset.pattern.permute.xlu0 %v3212_v2 }
  0x55   : >> { %1270 = vperm.xlu0 %1894, %v1795_v14  }
  0x56   : >> { %991 = vperm.xlu2 %1885, %v2197_v4  }
  0x5d   : >> { %447 = vperm.xlu0 %1894, %v283_v15  }
  0x5e   : >> { %1889 = vset.pattern.permute.xlu2 %v3212_v2 }
  0x5f   : >> { %1057 = vperm.xlu2 %1889, %v1792_v16  }
  0x67   : >> { %1892 = vset.pattern.permute.xlu2 %v3214_v13 }
  0x68   : >> { %1184 = vperm.xlu2 %1892, %v2179_v0  }
  0x70   : >> { %1893 = vset.pattern.permute.xlu2 %v3212_v2 }
  0x71   : >> { %1255 = vperm.xlu2 %1893, %v1794_v17  }
  0x74   : >> { %v2291_v38 = vpop.permute.xlu2 %403 }
  0x79   : >> { %1896 = vset.pattern.permute.xlu2 %v3213_v18 }
  0x7a   : >> { %1377 = vperm.xlu2 %1896, %v2202_v5  }
  0x7c   : >> { %v2313_v8 = vpop.permute.xlu2 %418 }
  0x82   : >> { %1417 = vperm.xlu2 %1896, %v2197_v4  }
  0x8a   : >> { %v329_v21 = vpop.permute.xlu1 %328  ;;  %v287_v22 = vpop.permute.xlu0 %286  ;;  %1898 = vset.pattern.permute.xlu2 %v3212_v2 }
  0x8b   : >> { %v2268_v23 = vsub.f32 %v2263_v19, %v329_v21  ;;  %v2271_v24 = vsub.f32 %v2265_v20, %v329_v21  ;;  %v2274_v25 = vsub.f32 %v2263_v19, %v287_v22  ;;  %v2277_v26 = vsub.f32 %v2265_v20, %v287_v22  ;;  %660 = vperm.xlu2 %1898, %v1787_v35  }
  0x8d   : >> { %v333_v27 = vmul.f32 %v2268_v23, %v2268_v23  ;;  %v334_v28 = vmul.f32 %v2271_v24, %v2271_v24  ;;  %v291_v29 = vmul.f32 %v2274_v25, %v2274_v25  ;;  %v292_v30 = vmul.f32 %v2277_v26, %v2277_v26 }
  0x8f   : >> { %v335_v31 = vrot.slane %v333_v27, 4  ;;  %v341_v32 = vrot.slane %v334_v28, 4  ;;  %v293_v33 = vrot.slane %v291_v29, 4  ;;  %v299_v34 = vrot.slane %v292_v30, 4 }
  0x91   : >> { %v294_v36 = vadd.f32 %v293_v33, %v291_v29  ;;  %v300_v37 = vadd.f32 %v299_v34, %v292_v30  ;;  %v336_v41 = vadd.f32 %v335_v31, %v333_v27  ;;  %v342_v42 = vadd.f32 %v341_v32, %v334_v28 }
  0x92   : >> { %v350_v39 = vpop.permute.xlu1 %349  ;;  %v308_v40 = vpop.permute.xlu0 %307 }
  0x93   : >> { %v2294_v43 = vsub.f32 %v2263_v19, %v350_v39  ;;  %v2297_v44 = vsub.f32 %v2265_v20, %v350_v39  ;;  %v2300_v45 = vsub.f32 %v2263_v19, %v308_v40  ;;  %v2303_v46 = vsub.f32 %v2265_v20, %v308_v40 }
  0x94   : >> { %v295_v47 = vrot.slane %v294_v36, 2  ;;  %v301_v48 = vrot.slane %v300_v37, 2  ;;  %v337_v53 = vrot.slane %v336_v41, 2  ;;  %v343_v54 = vrot.slane %v342_v42, 2 }
  0x95   : >> { %v354_v49 = vmul.f32 %v2294_v43, %v2294_v43  ;;  %v355_v50 = vmul.f32 %v2297_v44, %v2297_v44  ;;  %v312_v51 = vmul.f32 %v2300_v45, %v2300_v45  ;;  %v313_v52 = vmul.f32 %v2303_v46, %v2303_v46 }
  0x96   : >> { %v296_v59 = vadd.f32 %v295_v47, %v294_v36  ;;  %v302_v60 = vadd.f32 %v301_v48, %v300_v37  ;;  %v338_v6 = vadd.f32 %v337_v53, %v336_v41  ;;  %v344_v7 = vadd.f32 %v343_v54, %v342_v42 }
  0x97   : >> { %v356_v55 = vrot.slane %v354_v49, 4  ;;  %v362_v56 = vrot.slane %v355_v50, 4  ;;  %v314_v57 = vrot.slane %v312_v51, 4  ;;  %v320_v58 = vrot.slane %v313_v52, 4 }
  0x98   : >> { %v297_v15 = vrot.slane %v296_v59, 1  ;;  %v303_v16 = vrot.slane %v302_v60, 1  ;;  %v339_v28 = vrot.slane %v338_v6, 1  ;;  %v345_v29 = vrot.slane %v344_v7, 1 }
  0x99   : >> { %v357_v61 = vadd.f32 %v356_v55, %v354_v49  ;;  %v363_v62 = vadd.f32 %v362_v56, %v355_v50  ;;  %v315_v63 = vadd.f32 %v314_v57, %v312_v51  ;;  %v321_v3 = vadd.f32 %v320_v58, %v313_v52  ;;  %v2319_v51 = vpop.permute.xlu2 %545 }
  0x9a   : >> { %v298_v34 = vadd.f32 %v297_v15, %v296_v59  ;;  %v304_v35 = vadd.f32 %v303_v16, %v302_v60  ;;  %v340_v39 = vadd.f32 %v339_v28, %v338_v6  ;;  %v346_v40 = vadd.f32 %v345_v29, %v344_v7 }
  0x9b   : >> { %v358_v9 = vrot.slane %v357_v61, 2  ;;  %v364_v10 = vrot.slane %v363_v62, 2  ;;  %v316_v11 = vrot.slane %v315_v63, 2  ;;  %v322_v14 = vrot.slane %v321_v3, 2  ;;  %v2323_v54 = vpop.permute.xlu0 %505 }
  0x9d   : >> { %v359_v17 = vadd.f32 %v358_v9, %v357_v61  ;;  %v365_v21 = vadd.f32 %v364_v10, %v363_v62  ;;  %v317_v22 = vadd.f32 %v316_v11, %v315_v63  ;;  %v323_v27 = vadd.f32 %v322_v14, %v321_v3  ;;  %v1789_v62 = vld [vmem:[%s3208_s3 + $0x8] sm:$0xf] }
  0x9e   : >> { %844 = vperm.xlu1 %1884, %v1789_v62  }
  0x9f   : >> { %v360_v30 = vrot.slane %v359_v17, 1  ;;  %v366_v31 = vrot.slane %v365_v21, 1  ;;  %v318_v32 = vrot.slane %v317_v22, 1  ;;  %v324_v33 = vrot.slane %v323_v27, 1 }
  0xa1   : >> { %v319_v36 = vadd.f32 %v318_v32, %v317_v22  ;;  %v325_v37 = vadd.f32 %v324_v33, %v323_v27  ;;  %v361_v41 = vadd.f32 %v360_v30, %v359_v17  ;;  %v367_v42 = vadd.f32 %v366_v31, %v365_v21  ;;  %v2325_v59 = vpop.permute.xlu2 %616 }
  0xa3   : >> { %v369_v47 = vsel %vm368_vm0, %v298_v34, %v319_v36  ;;  %v370_v48 = vsel %vm368_vm0, %v304_v35, %v325_v37 }
  0xa4   : >> { %v372_v49 = vsel %vm371_vm1, %v369_v47, %v340_v39  ;;  %v373_v50 = vsel %vm371_vm1, %v370_v48, %v346_v40  ;;  %v2330_v7 = vpop.permute.xlu0 %631 }
  0xa5   : >> { %v375_v52 = vsel %vm374_vm2, %v372_v49, %v361_v41  ;;  %v376_v53 = vsel %vm374_vm2, %v373_v50, %v367_v42  ;;  %v526_v41 = vpop.permute.xlu1 %525 }
  0xa6   : >> { %1899 = vrsqrt.f32 %v375_v52  ;;  %vm384_vm3 = vcmp.eq.f32.partialorder %v375_v52, inf  ;;  %v387_v15 = vand.u32 2147483648, %v375_v52  ;;  %vm386_vm4 = vcmp.eq.f32.partialorder %v375_v52, 0.0  ;;  %1887 = vset.pattern.permute.xlu1 %v2070_v12 }
  0xa7   : >> { %1901 = vrsqrt.f32 %v376_v53  ;;  %vm396_vm5 = vcmp.eq.f32.partialorder %v376_v53, inf  ;;  %v399_v22 = vand.u32 2147483648, %v376_v53  ;;  %vm398_vm6 = vcmp.eq.f32.partialorder %v376_v53, 0.0  ;;  %971 = vperm.xlu1 %1887, %v2179_v0  }
  0xa9   : >> { %v2332_v17 = vpop.permute.xlu2 %738 }
  0xac   : >> { %v1900_v55 = vpop.eup %1899  ;;  %v2338_v32 = vpop.permute.xlu0 %829 }
  0xad   : >> { %v1902_v56 = vpop.eup %1901  ;;  %v378_v57 = vmul.f32 %v1900_v55, %v375_v52 }
  0xae   : >> { %v390_v58 = vmul.f32 %v1902_v56, %v376_v53 }
  0xaf   : >> { %v379_v60 = vmul.f32 %v1900_v55, %v378_v57  ;;  %1888 = vset.pattern.permute.xlu1 %v3212_v2 }
  0xb0   : >> { %v391_v61 = vmul.f32 %v1902_v56, %v390_v58 }
  0xb1   : >> { %v380_v63 = vmul.f32 0.5, %v379_v60  ;;  %v2340_v33 = vpop.permute.xlu2 %778 }
  0xb2   : >> { %v392_v3 = vmul.f32 0.5, %v391_v61 }
  0xb3   : >> { %v381_v6 = vsub.f32 1.5, %v380_v63 }
  0xb4   : >> { %v393_v9 = vsub.f32 1.5, %v392_v3 }
  0xb5   : >> { %v382_v10 = vmul.f32 %v1900_v55, %v381_v6  ;;  %v2343_v40 = vpop.permute.xlu0 %951 }
  0xb6   : >> { %v394_v11 = vmul.f32 %v1902_v56, %v393_v9  ;;  %3221 = vst [vmem:[#allocation6_spill] sm:$0xff] %v2343_v40 }
  0xb7   : >> { %v383_v14 = vmul.f32 %v382_v10, %v375_v52 }
  0xb8   : >> { %v395_v16 = vmul.f32 %v394_v11, %v376_v53 }
  0xb9   : >> { %v385_v21 = vsel %vm384_vm3, %v375_v52, %v383_v14  ;;  %v2361_v55 = vpop.permute.xlu2 %931 }
  0xba   : >> { %v388_v27 = vsel %vm386_vm4, %v387_v15, %v385_v21  ;;  %v397_v28 = vsel %vm396_vm5, %v376_v53, %v395_v16  ;;  %3222 = vst [vmem:[#allocation7_spill] sm:$0xff] %v2361_v55 }
  0xbb   : >> { %v400_v29 = vsel %vm398_vm6, %v399_v22, %v397_v28  ;;  %v406_v30 = vadd.f32 %v2291_v38, %v388_v27 }
  0xbc   : >> { %v407_v31 = vadd.f32 %v2291_v38, %v400_v29 }
  0xbd   : >> { %1903 = vrcp.f32 %v406_v30 }
  0xbe   : >> { %1905 = vrcp.f32 %v407_v31 }
  0xc3   : >> { %v1904_v34 = vpop.eup %1903 }
  0xc4   : >> { %v1906_v12 = vpop.eup %1905  ;;  %v410_v35 = vmul.f32 %v1904_v34, %v406_v30 }
  0xc5   : >> { %v411_v36 = vmul.f32 %v1906_v12, %v407_v31 }
  0xc6   : >> { %v412_v37 = vsub.f32 2.0, %v410_v35 }
  0xc7   : >> { %v413_v39 = vsub.f32 2.0, %v411_v36 }
  0xc8   : >> { %v2345_v42 = vmul.f32 %v1904_v34, %v412_v37 }
  0xc9   : >> { %v2347_v38 = vmul.f32 %v1906_v12, %v413_v39  ;;  %v2440_v12 = vpop.permute.xlu2 %991 }
  0xca   : >> { %v2351_v47 = vmul.f32 %v2313_v8, %v2345_v42  ;;  %3224 = vst [vmem:[#allocation9_spill] sm:$0xff] %v2440_v12 }
  0xcb   : >> { %v2355_v48 = vmul.f32 %v2313_v8, %v2347_v38 }
  0xcc   : >> { %v486_v49 = vperm.slane %v2351_v47, 2  ;;  %v480_v50 = vperm.slane %v2351_v47, 1  ;;  %v474_v52 = vperm.slane %v2351_v47, 0  ;;  %v492_v53 = vperm.slane %v2351_v47, 3 }
  0xcd   : >> { %v487_v56 = vperm.slane %v2355_v48, 2  ;;  %v481_v57 = vperm.slane %v2355_v48, 1  ;;  %v475_v58 = vperm.slane %v2355_v48, 0  ;;  %v493_v60 = vperm.slane %v2355_v48, 3 }
  0xce   : >> { %v488_v8 = vmul.f32 %v486_v49, %v2268_v23  ;;  %v482_v61 = vmul.f32 %v480_v50, %v2300_v45  ;;  %v476_v62 = vmul.f32 %v474_v52, %v2274_v25  ;;  %v494_v63 = vmul.f32 %v492_v53, %v2294_v43  ;;  %v2393_v43 = vpop.permute.xlu0 %1144  ;;  %v566_v45 = vpop.permute.xlu1 %565 }
  0xcf   : >> { %v489_v3 = vmul.f32 %v487_v56, %v2271_v24  ;;  %v483_v6 = vmul.f32 %v481_v57, %v2303_v46  ;;  %v477_v9 = vmul.f32 %v475_v58, %v2277_v26  ;;  %v495_v10 = vmul.f32 %v493_v60, %v2297_v44  ;;  %v1790_v24 = vld [vmem:[%s3209_s4 + $0x8] sm:$0xf]  ;;  %3223 = vst [vmem:[#allocation8_spill] sm:$0xff] %v2393_v43 }
  0xd0   : >> { %v2376_v11 = vadd.f32 %v488_v8, %v2263_v19  ;;  %v2379_v14 = vadd.f32 %v482_v61, %v2263_v19  ;;  %v2382_v23 = vadd.f32 %v476_v62, %v2263_v19  ;;  %v2385_v25 = vadd.f32 %v494_v63, %v2263_v19  ;;  %873 = vperm.xlu0 %1894, %v1790_v24  }
  0xd1   : >> { %v2391_v26 = vadd.f32 %v489_v3, %v2265_v20  ;;  %v2396_v44 = vadd.f32 %v483_v6, %v2265_v20  ;;  %v2399_v46 = vadd.f32 %v477_v9, %v2265_v20  ;;  %v2402_v15 = vadd.f32 %v495_v10, %v2265_v20 }
  0xd2   : >> { %v2406_v19 = vsub.f32 %v2376_v11, %v2319_v51  ;;  %v2409_v16 = vsub.f32 %v2379_v14, %v526_v41  ;;  %v2413_v21 = vsub.f32 %v2382_v23, %v2323_v54  ;;  %v2416_v22 = vsub.f32 %v2385_v25, %v566_v45 }
  0xd3   : >> { %v2420_v27 = vsub.f32 %v2391_v26, %v2319_v51  ;;  %v2423_v20 = vsub.f32 %v2396_v44, %v526_v41  ;;  %v2427_v28 = vsub.f32 %v2399_v46, %v2323_v54  ;;  %v2430_v29 = vsub.f32 %v2402_v15, %v566_v45 }
  0xd4   : >> { %v550_v30 = vmul.f32 %v2406_v19, %v2406_v19  ;;  %v530_v31 = vmul.f32 %v2409_v16, %v2409_v16  ;;  %v510_v51 = vmul.f32 %v2413_v21, %v2413_v21  ;;  %v570_v34 = vmul.f32 %v2416_v22, %v2416_v22 }
  0xd5   : >> { %v551_v54 = vmul.f32 %v2420_v27, %v2420_v27  ;;  %v531_v35 = vmul.f32 %v2423_v20, %v2423_v20  ;;  %v511_v36 = vmul.f32 %v2427_v28, %v2427_v28  ;;  %v571_v37 = vmul.f32 %v2430_v29, %v2430_v29 }
  0xd6   : >> { %v552_v39 = vrot.slane %v550_v30, 4  ;;  %v532_v41 = vrot.slane %v530_v31, 4  ;;  %v512_v49 = vrot.slane %v510_v51, 4  ;;  %v572_v50 = vrot.slane %v570_v34, 4  ;;  %v2450_v13 = vpop.permute.xlu0 %1270 }
  0xd7   : >> { %v558_v52 = vrot.slane %v551_v54, 4  ;;  %v538_v53 = vrot.slane %v531_v35, 4  ;;  %v518_v56 = vrot.slane %v511_v36, 4  ;;  %v578_v57 = vrot.slane %v571_v37, 4 }
  0xd8   : >> { %v553_v58 = vadd.f32 %v552_v39, %v550_v30  ;;  %v533_v60 = vadd.f32 %v532_v41, %v530_v31  ;;  %v513_v8 = vadd.f32 %v512_v49, %v510_v51  ;;  %v573_v61 = vadd.f32 %v572_v50, %v570_v34  ;;  %v2452_v51 = vpop.permute.xlu2 %1057  ;;  %v1791_v34 = vld [vmem:[%s3207_s2 + $0xc] sm:$0xf] }
  0xd9   : >> { %v559_v62 = vadd.f32 %v558_v52, %v551_v54  ;;  %v539_v63 = vadd.f32 %v538_v53, %v531_v35  ;;  %v519_v3 = vadd.f32 %v518_v56, %v511_v36  ;;  %v579_v6 = vadd.f32 %v578_v57, %v571_v37  ;;  %1042 = vperm.xlu1 %1888, %v1791_v34  }
  0xda   : >> { %v554_v9 = vrot.slane %v553_v58, 2  ;;  %v534_v10 = vrot.slane %v533_v60, 2  ;;  %v514_v24 = vrot.slane %v513_v8, 2  ;;  %v574_v45 = vrot.slane %v573_v61, 2 }
  0xdb   : >> { %v560_v2 = vrot.slane %v559_v62, 2  ;;  %v540_v18 = vrot.slane %v539_v63, 2  ;;  %v520_v43 = vrot.slane %v519_v3, 2  ;;  %v580_v12 = vrot.slane %v579_v6, 2 }
  0xdc   : >> { %v555_v40 = vadd.f32 %v554_v9, %v553_v58  ;;  %v535_v55 = vadd.f32 %v534_v10, %v533_v60  ;;  %v515_v30 = vadd.f32 %v514_v24, %v513_v8  ;;  %v575_v31 = vadd.f32 %v574_v45, %v573_v61 }
  0xdd   : >> { %v561_v54 = vadd.f32 %v560_v2, %v559_v62  ;;  %v541_v35 = vadd.f32 %v540_v18, %v539_v63  ;;  %v521_v36 = vadd.f32 %v520_v43, %v519_v3  ;;  %v581_v37 = vadd.f32 %v580_v12, %v579_v6 }
  0xde   : >> { %v556_v39 = vrot.slane %v555_v40, 1  ;;  %v536_v41 = vrot.slane %v535_v55, 1  ;;  %v516_v49 = vrot.slane %v515_v30, 1  ;;  %v576_v50 = vrot.slane %v575_v31, 1  ;;  %v448_v45 = vpop.permute.xlu0 %447 }
  0xdf   : >> { %v562_v52 = vrot.slane %v561_v54, 1  ;;  %v542_v53 = vrot.slane %v541_v35, 1  ;;  %v522_v56 = vrot.slane %v521_v36, 1  ;;  %v582_v57 = vrot.slane %v581_v37, 1 }
  0xe0   : >> { %v557_v58 = vadd.f32 %v556_v39, %v555_v40  ;;  %v537_v60 = vadd.f32 %v536_v41, %v535_v55  ;;  %v517_v8 = vadd.f32 %v516_v49, %v515_v30  ;;  %v577_v24 = vadd.f32 %v576_v50, %v575_v31  ;;  %v2466_v55 = vpop.permute.xlu2 %1184 }
  0xe1   : >> { %v563_v61 = vadd.f32 %v562_v52, %v561_v54  ;;  %v543_v9 = vadd.f32 %v542_v53, %v541_v35  ;;  %v523_v10 = vadd.f32 %v522_v56, %v521_v36  ;;  %v423_v18 = vadd.f32 1.0, %v2351_v47 }
  0xe2   : >> { %v584_v2 = vsel %vm368_vm0, %v517_v8, %v537_v60  ;;  %v583_v43 = vadd.f32 %v582_v57, %v581_v37  ;;  %v432_v63 = vadd.f32 1.0, %v2355_v48  ;;  %v3225_v30 = vmov 4  }
  0xe3   : >> { %v585_v12 = vsel %vm368_vm0, %v523_v10, %v543_v9  ;;  %v586_v62 = vsel %vm371_vm1, %v584_v2, %v557_v58  ;;  %1907 = vlog2.f32 %v423_v18  ;;  %1891 = vset.pattern.permute.xlu1 %v3225_v30  ;;  %v426_v31 = vmul.f32 -0.5, %v2351_v47 }
  0xe4   : >> { %v587_v3 = vsel %vm371_vm1, %v585_v12, %v563_v61  ;;  %v2464_v40 = vsel %vm374_vm2, %v586_v62, %v577_v24  ;;  %1164 = vperm.xlu1 %1891, %v2202_v5   ;;  %v450_v34 = vmul.f32 %v448_v45, %v2345_v42  ;;  %v451_v54 = vmul.f32 %v448_v45, %v2347_v38 }
  0xe5   : >> { %v2469_v6 = vsel %vm374_vm2, %v587_v3, %v583_v43  ;;  %1909 = vrsqrt.f32 %v2464_v40  ;;  %v435_v35 = vmul.f32 -0.5, %v2355_v48  ;;  %v427_v52 = vadd.f32 1.0, %v426_v31 }
  0xe6   : >> { %1911 = vrsqrt.f32 %v2469_v6  ;;  %v452_v37 = vmul.f32 %v450_v34, %v2345_v42  ;;  %v453_v39 = vmul.f32 %v451_v54, %v2347_v38  ;;  %v429_v5 = vand.u32 2147483647, %v2351_v47 }
  0xe7   : >> { %1913 = vlog2.f32 %v432_v63  ;;  %v436_v60 = vadd.f32 1.0, %v435_v35  ;;  %v438_v24 = vand.u32 2147483647, %v2355_v48  ;;  %vm597_vm7 = vcmp.eq.f32.partialorder %v2464_v40, inf }
  0xe8   : >> { %v454_v53 = vadd.f32 1.0, %v452_v37  ;;  %v2483_v56 = vpop.permute.xlu2 %1255  ;;  %v457_v8 = vmul.f32 -0.5, %v452_v37  ;;  %v463_v61 = vadd.f32 1.0, %v453_v39  ;;  %v466_v38 = vmul.f32 -0.5, %v453_v39 }
  0xe9   : >> { %v1908_v36 = vpop.eup %1907  ;;  %v428_v18 = vmul.f32 %v427_v52, %v2351_v47  ;;  %vm2490_vm8 = vcmp.lt.f32.partialorder %v429_v5, 0.0004427343  ;;  %v437_v63 = vmul.f32 %v436_v60, %v2355_v48  ;;  %v460_v30 = vand.u32 2147483647, %v452_v37  ;;  %v1797_v47 = vld [vmem:[%s3207_s2 + $0x14] sm:$0xf] }
  0xea   : >> { %v425_v42 = vmul.f32 0.6931472, %v1908_v36  ;;  %1915 = vlog2.f32 %v454_v53  ;;  %v458_v3 = vadd.f32 1.0, %v457_v8  ;;  %v467_v31 = vadd.f32 1.0, %v466_v38 }
  0xeb   : >> { %v1910_v41 = vpop.eup %1909  ;;  %1917 = vlog2.f32 %v463_v61  ;;  %vm599_vm9 = vcmp.eq.f32.partialorder %v2464_v40, 0.0  ;;  %vm2498_vm10 = vcmp.lt.f32.partialorder %v438_v24, 0.0004427343  ;;  %v469_v54 = vand.u32 2147483647, %v453_v39 }
  0xec   : >> { %v1912_v49 = vpop.eup %1911  ;;  %v591_v50 = vmul.f32 %v1910_v41, %v2464_v40  ;;  %1204 = vperm.xlu1 %1891, %v2197_v4   ;;  %v431_v4 = vsel %vm2490_vm8, %v428_v18, %v425_v42  ;;  %vm609_vm11 = vcmp.eq.f32.partialorder %v2469_v6, inf  ;;  %v459_v60 = vmul.f32 %v458_v3, %v452_v37 }
  0xed   : >> { %v1914_v57 = vpop.eup %1913  ;;  %v603_v58 = vmul.f32 %v1912_v49, %v2469_v6  ;;  %vm461_vm12 = vcmp.lt.f32.partialorder %v460_v30, 0.0004427343  ;;  %vm470_vm13 = vcmp.lt.f32.partialorder %v469_v54, 0.0004427343  ;;  %v612_v37 = vand.u32 2147483648, %v2469_v6 }
  0xee   : >> { %v592_v9 = vmul.f32 %v1910_v41, %v591_v50  ;;  %v434_v43 = vmul.f32 0.6931472, %v1914_v57  ;;  %v600_v50 = vand.u32 2147483648, %v2464_v40  ;;  %v441_v57 = vmul.f32 7.0, %v431_v4 }
  0xef   : >> { %v604_v10 = vmul.f32 %v1912_v49, %v603_v58  ;;  %vm611_vm14 = vcmp.eq.f32.partialorder %v2469_v6, 0.0 }
  0xf0   : >> { %v593_v2 = vmul.f32 0.5, %v592_v9  ;;  %v1916_v35 = vpop.eup %1915  ;;  %v440_v48 = vsel %vm2498_vm10, %v437_v63, %v434_v43  ;;  %v2506_v52 = vpop.permute.xlu2 %1377  ;;  %v468_v9 = vmul.f32 %v467_v31, %v453_v39 }
  0xf1   : >> { %v605_v12 = vmul.f32 0.5, %v604_v10  ;;  %v1918_v5 = vpop.eup %1917  ;;  %v456_v58 = vmul.f32 0.6931472, %v1916_v35  ;;  %v442_v38 = vmul.f32 7.0, %v440_v48 }
  0xf2   : >> { %v594_v45 = vsub.f32 1.5, %v593_v2  ;;  %v465_v61 = vmul.f32 0.6931472, %v1918_v5 }
  0xf3   : >> { %v606_v34 = vsub.f32 1.5, %v605_v12  ;;  %v462_v10 = vsel %vm461_vm12, %v459_v60, %v456_v58 }
  0xf4   : >> { %v595_v36 = vmul.f32 %v1910_v41, %v594_v45  ;;  %v3230_v41 = vmov 5   ;;  %v471_v24 = vsel %vm470_vm13, %v468_v9, %v465_v61  ;;  %v2516_v2 = vadd.f32 %v462_v10, %v441_v57 }
  0xf5   : >> { %v607_v53 = vmul.f32 %v1912_v49, %v606_v34  ;;  %1895 = vset.pattern.permute.xlu1 %v3230_v41  ;;  %v2524_v43 = vadd.f32 %v471_v24, %v442_v38  ;;  %v3231_v34 = vmov 0  }
  0xf6   : >> { %v596_v8 = vmul.f32 %v595_v36, %v2464_v40  ;;  %1357 = vperm.xlu1 %1895, %v2184_v1  }
  0xf7   : >> { %v608_v42 = vmul.f32 %v607_v53, %v2469_v6 }
  0xf8   : >> { %v598_v49 = vsel %vm597_vm7, %v2464_v40, %v596_v8  ;;  %v2528_v63 = vpop.permute.xlu2 %1417 }
  0xf9   : >> { %v601_v39 = vsel %vm599_vm9, %v600_v50, %v598_v49  ;;  %v610_v18 = vsel %vm609_vm11, %v2469_v6, %v608_v42  ;;  %v1793_v42 = vld [vmem:[%s3209_s4 + $0xc] sm:$0xf] }
  0xfa   : >> { %v613_v1 = vsel %vm611_vm14, %v612_v37, %v610_v18  ;;  %v619_v12 = vadd.f32 %v2325_v59, %v601_v39 }
  0xfb   : >> { %v620_v62 = vadd.f32 %v2325_v59, %v613_v1 }
  0xfc   : >> { %1919 = vrcp.f32 %v619_v12 }
  0xfd   : >> { %1921 = vrcp.f32 %v620_v62 }
  0xfe   : >> { %1397 = vperm.xlu1 %1895, %v2179_v0  }
 0x100   : >> { %v661_v54 = vpop.permute.xlu2 %660 }
 0x102   : >> { %v1920_v40 = vpop.eup %1919 }
 0x103   : >> { %v1922_v3 = vpop.eup %1921  ;;  %v623_v45 = vmul.f32 %v1920_v40, %v619_v12 }
 0x104   : >> { %v624_v4 = vmul.f32 %v1922_v3, %v620_v62 }
 0x105   : >> { %v625_v30 = vsub.f32 2.0, %v623_v45 }
 0x106   : >> { %v626_v31 = vsub.f32 2.0, %v624_v4  ;;  %1897 = vset.pattern.permute.xlu1 %v3231_v34 }
 0x107   : >> { %v627_v6 = vmul.f32 %v1920_v40, %v625_v30  ;;  %1468 = vperm.xlu1 %1897, %v1797_v47  }
 0x108   : >> { %v628_v59 = vmul.f32 %v1922_v3, %v626_v31 }
 0x109   : >> { %v2536_v35 = vmul.f32 %v2330_v7, %v627_v6  ;;  %v663_v5 = vmul.f32 %v661_v54, %v627_v6 }
 0x10a   : >> { %v2539_v0 = vmul.f32 %v2330_v7, %v628_v59  ;;  %v664_v39 = vmul.f32 %v661_v54, %v628_v59 }
 0x10b   : >> { %v705_v36 = vperm.slane %v2536_v35, 3  ;;  %v687_v50 = vperm.slane %v2536_v35, 0  ;;  %v636_v48 = vadd.f32 1.0, %v2536_v35  ;;  %v639_v58 = vmul.f32 -0.5, %v2536_v35 }
 0x10c   : >> { %v706_v53 = vperm.slane %v2539_v0, 3  ;;  %v688_v57 = vperm.slane %v2539_v0, 0  ;;  %v645_v60 = vadd.f32 1.0, %v2539_v0  ;;  %v642_v9 = vand.u32 2147483647, %v2536_v35 }
 0x10d   : >> { %v707_v8 = vmul.f32 %v705_v36, %v2416_v22  ;;  %v689_v7 = vmul.f32 %v687_v50, %v2413_v21  ;;  %1923 = vlog2.f32 %v636_v48  ;;  %v648_v41 = vmul.f32 -0.5, %v2539_v0 }
 0x10e   : >> { %v690_v61 = vmul.f32 %v688_v57, %v2427_v28  ;;  %1925 = vlog2.f32 %v645_v60  ;;  %v708_v38 = vmul.f32 %v706_v53, %v2430_v29  ;;  %v640_v10 = vadd.f32 1.0, %v639_v58 }
 0x10f   : >> { %v665_v49 = vmul.f32 %v663_v5, %v627_v6  ;;  %1086 = vperm.xlu1 %1897, %v1793_v42   ;;  %v2558_v22 = vadd.f32 %v707_v8, %v2385_v25  ;;  %v2561_v21 = vadd.f32 %v689_v7, %v2382_v23  ;;  %v649_v28 = vadd.f32 1.0, %v648_v41  ;;  %v719_v23 = vpop.permute.xlu1 %718 }
 0x110   : >> { %v2564_v37 = vadd.f32 %v690_v61, %v2399_v46  ;;  %v651_v24 = vand.u32 2147483647, %v2539_v0  ;;  %vm2567_vm15 = vcmp.lt.f32.partialorder %v642_v9, 0.0004427343  ;;  %v2572_v25 = vadd.f32 %v708_v38, %v2402_v15 }
 0x111   : >> { %v667_v18 = vadd.f32 1.0, %v665_v49  ;;  %v670_v12 = vmul.f32 -0.5, %v665_v49  ;;  %v641_v3 = vmul.f32 %v640_v10, %v2536_v35  ;;  %v2577_v46 = vsub.f32 %v2558_v22, %v2340_v33 }
 0x112   : >> { %v2580_v45 = vsub.f32 %v2561_v21, %v719_v23  ;;  %v650_v30 = vmul.f32 %v649_v28, %v2539_v0  ;;  %v2584_v31 = vsub.f32 %v2564_v37, %v719_v23  ;;  %vm652_vm3 = vcmp.lt.f32.partialorder %v651_v24, 0.0004427343 }
 0x113   : >> { %v1924_v1 = vpop.eup %1923  ;;  %1927 = vlog2.f32 %v667_v18  ;;  %v666_v6 = vmul.f32 %v664_v39, %v628_v59  ;;  %v671_v54 = vadd.f32 1.0, %v670_v12  ;;  %v2590_v36 = vsub.f32 %v2572_v25, %v2340_v33 }
 0x114   : >> { %v1926_v62 = vpop.eup %1925  ;;  %v638_v40 = vmul.f32 0.6931472, %v1924_v1  ;;  %v673_v48 = vand.u32 2147483647, %v665_v49  ;;  %v723_v5 = vmul.f32 %v2580_v45, %v2580_v45  ;;  %v783_v58 = vmul.f32 %v2577_v46, %v2577_v46 }
 0x115   : >> { %v647_v4 = vmul.f32 0.6931472, %v1926_v62  ;;  %v724_v59 = vmul.f32 %v2584_v31, %v2584_v31  ;;  %v676_v8 = vadd.f32 1.0, %v666_v6  ;;  %v672_v33 = vmul.f32 %v671_v54, %v665_v49 }
 0x116   : >> { %v644_v15 = vsel %vm2567_vm15, %v641_v3, %v638_v40  ;;  %v679_v61 = vmul.f32 -0.5, %v666_v6  ;;  %v784_v9 = vmul.f32 %v2590_v36, %v2590_v36  ;;  %vm674_vm4 = vcmp.lt.f32.partialorder %v673_v48, 0.0004427343 }
 0x117   : >> { %v653_v34 = vsel %vm652_vm3, %v650_v30, %v647_v4  ;;  %v654_v47 = vmul.f32 7.0, %v644_v15  ;;  %1929 = vlog2.f32 %v676_v8  ;;  %v725_v41 = vrot.slane %v723_v5, 4 }
 0x118   : >> { %v655_v50 = vmul.f32 7.0, %v653_v34  ;;  %v785_v42 = vrot.slane %v783_v58, 4  ;;  %v731_v38 = vrot.slane %v724_v59, 4  ;;  %v680_v28 = vadd.f32 1.0, %v679_v61 }
 0x119   : >> { %v656_v53 = vadd.f32 %v654_v47, %v2516_v2  ;;  %v1928_v57 = vpop.eup %1927  ;;  %v693_v24 = vperm.slane %v2536_v35, 1  ;;  %v791_v39 = vrot.slane %v784_v9, 4  ;;  %v694_v18 = vperm.slane %v2539_v0, 1 }
 0x11a   : >> { %v657_v60 = vadd.f32 %v655_v50, %v2524_v43  ;;  %v669_v7 = vmul.f32 0.6931472, %v1928_v57  ;;  %v682_v43 = vand.u32 2147483647, %v666_v6  ;;  %v699_v49 = vperm.slane %v2536_v35, 2 }
 0x11b   : >> { %v726_v1 = vadd.f32 %v725_v41, %v723_v5  ;;  %v695_v29 = vmul.f32 %v693_v24, %v2409_v16  ;;  %v700_v12 = vperm.slane %v2539_v0, 2  ;;  %v786_v23 = vadd.f32 %v785_v42, %v783_v58 }
 0x11c   : >> { %v675_v2 = vsel %vm674_vm4, %v672_v33, %v669_v7  ;;  %v732_v40 = vadd.f32 %v731_v38, %v724_v59  ;;  %v696_v3 = vmul.f32 %v694_v18, %v2423_v20  ;;  %v701_v4 = vmul.f32 %v699_v49, %v2406_v19  ;;  %v759_v20 = vpop.permute.xlu1 %758 }
 0x11d   : >> { %v2602_v10 = vadd.f32 %v675_v2, %v656_v53  ;;  %v1930_v62 = vpop.eup %1929  ;;  %v681_v15 = vmul.f32 %v680_v28, %v666_v6  ;;  %v2612_v34 = vadd.f32 %v695_v29, %v2379_v14  ;;  %v702_v47 = vmul.f32 %v700_v12, %v2420_v27 }
 0x11e   : >> { %v678_v30 = vmul.f32 0.6931472, %v1930_v62  ;;  %v792_v35 = vadd.f32 %v791_v39, %v784_v9  ;;  %vm683_vm5 = vcmp.lt.f32.partialorder %v682_v43, 0.0004427343  ;;  %v2616_v16 = vadd.f32 %v696_v3, %v2396_v44 }
 0x11f   : >> { %v2619_v0 = vadd.f32 %v701_v4, %v2376_v11  ;;  %v727_v54 = vrot.slane %v726_v1, 2  ;;  %v2622_v19 = vadd.f32 %v702_v47, %v2391_v26  ;;  %v2626_v14 = vsub.f32 %v2612_v34, %v2332_v17 }
 0x120   : >> { %v684_v50 = vsel %vm683_vm5, %v681_v15, %v678_v30  ;;  %v733_v6 = vrot.slane %v732_v40, 2  ;;  %v2632_v44 = vsub.f32 %v2616_v16, %v2332_v17  ;;  %v787_v57 = vrot.slane %v786_v23, 2 }
 0x121   : >> { %v2628_v27 = vadd.f32 %v684_v50, %v657_v60  ;;  %v2635_v11 = vsub.f32 %v2619_v0, %v759_v20  ;;  %v743_v48 = vmul.f32 %v2626_v14, %v2626_v14  ;;  %v2640_v26 = vsub.f32 %v2622_v19, %v759_v20 }
 0x122   : >> { %v744_v5 = vmul.f32 %v2632_v44, %v2632_v44  ;;  %v728_v58 = vadd.f32 %v727_v54, %v726_v1  ;;  %v793_v60 = vrot.slane %v792_v35, 2  ;;  %v734_v8 = vadd.f32 %v733_v6, %v732_v40 }
 0x123   : >> { %v763_v53 = vmul.f32 %v2635_v11, %v2635_v11  ;;  %v745_v59 = vrot.slane %v743_v48, 4  ;;  %v764_v17 = vmul.f32 %v2640_v26, %v2640_v26  ;;  %v788_v42 = vadd.f32 %v787_v57, %v786_v23 }
 0x124   : >> { %v751_v7 = vrot.slane %v744_v5, 4  ;;  %v729_v38 = vrot.slane %v728_v58, 1  ;;  %v794_v39 = vadd.f32 %v793_v60, %v792_v35  ;;  %v735_v43 = vrot.slane %v734_v8, 1 }
 0x125   : >> { %v765_v33 = vrot.slane %v763_v53, 4  ;;  %v746_v61 = vadd.f32 %v745_v59, %v743_v48  ;;  %v771_v9 = vrot.slane %v764_v17, 4  ;;  %v789_v3 = vrot.slane %v788_v42, 1 }
 0x126   : >> { %v752_v41 = vadd.f32 %v751_v7, %v744_v5  ;;  %v730_v40 = vadd.f32 %v729_v38, %v728_v58  ;;  %v795_v15 = vrot.slane %v794_v39, 1  ;;  %v736_v47 = vadd.f32 %v735_v43, %v734_v8 }
 0x127   : >> { %v766_v2 = vadd.f32 %v765_v33, %v763_v53  ;;  %v747_v28 = vrot.slane %v746_v61, 2  ;;  %v772_v24 = vadd.f32 %v771_v9, %v764_v17  ;;  %v790_v35 = vadd.f32 %v789_v3, %v788_v42 }
 0x128   : >> { %v753_v18 = vrot.slane %v752_v41, 2  ;;  %v796_v57 = vadd.f32 %v795_v15, %v794_v39  ;;  %v1798_v15 = vld [vmem:[%s3208_s3 + $0x14] sm:$0xf] }
 0x129   : >> { %v767_v49 = vrot.slane %v766_v2, 2  ;;  %v748_v1 = vadd.f32 %v747_v28, %v746_v61  ;;  %v773_v29 = vrot.slane %v772_v24, 2  ;;  %1483 = vperm.xlu0 %1894, %v1798_v15  }
 0x12a   : >> { %v754_v12 = vadd.f32 %v753_v18, %v752_v41 }
 0x12b   : >> { %v768_v62 = vadd.f32 %v767_v49, %v766_v2  ;;  %v749_v4 = vrot.slane %v748_v1, 1  ;;  %v774_v30 = vadd.f32 %v773_v29, %v772_v24 }
 0x12c   : >> { %v755_v54 = vrot.slane %v754_v12, 1 }
 0x12d   : >> { %v769_v50 = vrot.slane %v768_v62, 1  ;;  %v750_v23 = vadd.f32 %v749_v4, %v748_v1  ;;  %v775_v20 = vrot.slane %v774_v30, 1 }
 0x12e   : >> { %v756_v6 = vadd.f32 %v755_v54, %v754_v12 }
 0x12f   : >> { %v770_v48 = vadd.f32 %v769_v50, %v768_v62  ;;  %v776_v5 = vadd.f32 %v775_v20, %v774_v30  ;;  %v797_v53 = vsel %vm368_vm0, %v730_v40, %v750_v23 }
 0x130   : >> { %v798_v59 = vsel %vm368_vm0, %v736_v47, %v756_v6  ;;  %v845_v6 = vpop.permute.xlu1 %844 }
 0x131   : >> { %v799_v17 = vsel %vm371_vm1, %v797_v53, %v770_v48  ;;  %v800_v58 = vsel %vm371_vm1, %v798_v59, %v776_v5 }
 0x132   : >> { %v801_v60 = vsel %vm374_vm2, %v799_v17, %v790_v35  ;;  %v802_v8 = vsel %vm374_vm2, %v800_v58, %v796_v57 }
 0x133   : >> { %1931 = vrsqrt.f32 %v801_v60  ;;  %vm810_vm6 = vcmp.eq.f32.partialorder %v801_v60, inf  ;;  %v813_v49 = vand.u32 2147483648, %v801_v60  ;;  %vm812_vm7 = vcmp.eq.f32.partialorder %v801_v60, 0.0 }
 0x134   : >> { %1933 = vrsqrt.f32 %v802_v8  ;;  %vm822_vm8 = vcmp.eq.f32.partialorder %v802_v8, inf  ;;  %v825_v12 = vand.u32 2147483648, %v802_v8  ;;  %vm824_vm9 = vcmp.eq.f32.partialorder %v802_v8, 0.0 }
 0x139   : >> { %v1932_v7 = vpop.eup %1931 }
 0x13a   : >> { %v1934_v33 = vpop.eup %1933  ;;  %v804_v61 = vmul.f32 %v1932_v7, %v801_v60 }
 0x13b   : >> { %v816_v9 = vmul.f32 %v1934_v33, %v802_v8 }
 0x13c   : >> { %v805_v41 = vmul.f32 %v1932_v7, %v804_v61 }
 0x13d   : >> { %v817_v2 = vmul.f32 %v1934_v33, %v816_v9 }
 0x13e   : >> { %v806_v42 = vmul.f32 0.5, %v805_v41 }
 0x13f   : >> { %v818_v38 = vmul.f32 0.5, %v817_v2 }
 0x140   : >> { %v807_v28 = vsub.f32 1.5, %v806_v42 }
 0x141   : >> { %v819_v24 = vsub.f32 1.5, %v818_v38 }
 0x142   : >> { %v808_v39 = vmul.f32 %v1932_v7, %v807_v28  ;;  %v874_v35 = vpop.permute.xlu0 %873 }
 0x143   : >> { %v820_v43 = vmul.f32 %v1934_v33, %v819_v24 }
 0x144   : >> { %v809_v18 = vmul.f32 %v808_v39, %v801_v60 }
 0x145   : >> { %v821_v1 = vmul.f32 %v820_v43, %v802_v8 }
 0x146   : >> { %v811_v29 = vsel %vm810_vm6, %v801_v60, %v809_v18 }
 0x147   : >> { %v814_v62 = vsel %vm812_vm7, %v813_v49, %v811_v29  ;;  %v823_v3 = vsel %vm822_vm8, %v802_v8, %v821_v1 }
 0x148   : >> { %v826_v40 = vsel %vm824_vm9, %v825_v12, %v823_v3  ;;  %v832_v4 = vadd.f32 %v2338_v32, %v814_v62 }
 0x149   : >> { %v833_v30 = vadd.f32 %v2338_v32, %v826_v40 }
 0x14a   : >> { %1935 = vrcp.f32 %v832_v4 }
 0x14b   : >> { %1937 = vrcp.f32 %v833_v30 }
 0x150   : >> { %v1936_v47 = vpop.eup %1935 }
 0x151   : >> { %v1938_v54 = vpop.eup %1937  ;;  %v836_v50 = vmul.f32 %v1936_v47, %v832_v4 }
 0x152   : >> { %v837_v23 = vmul.f32 %v1938_v54, %v833_v30 }
 0x153   : >> { %v838_v20 = vsub.f32 2.0, %v836_v50 }
 0x154   : >> { %v839_v48 = vsub.f32 2.0, %v837_v23 }
 0x155   : >> { %v840_v5 = vmul.f32 %v1936_v47, %v838_v20 }
 0x156   : >> { %v841_v53 = vmul.f32 %v1938_v54, %v839_v48 }
 0x157   : >> { %v2659_v57 = vmul.f32 %v845_v6, %v840_v5  ;;  %v876_v32 = vmul.f32 %v874_v35, %v840_v5 }
 0x158   : >> { %v2661_v59 = vmul.f32 %v845_v6, %v841_v53  ;;  %v877_v17 = vmul.f32 %v874_v35, %v841_v53 }
 0x159   : >> { %v849_v58 = vadd.f32 1.0, %v2659_v57  ;;  %v852_v60 = vmul.f32 -0.5, %v2659_v57  ;;  %v855_v8 = vand.u32 2147483647, %v2659_v57  ;;  %v878_v7 = vmul.f32 %v876_v32, %v840_v5  ;;  %v972_v32 = vpop.permute.xlu1 %971 }
 0x15a   : >> { %v858_v33 = vadd.f32 1.0, %v2661_v59  ;;  %v861_v61 = vmul.f32 -0.5, %v2661_v59  ;;  %v864_v9 = vand.u32 2147483647, %v2661_v59  ;;  %v879_v41 = vmul.f32 %v877_v17, %v841_v53 }
 0x15b   : >> { %1939 = vlog2.f32 %v849_v58  ;;  %v853_v2 = vadd.f32 1.0, %v852_v60  ;;  %vm2669_vm10 = vcmp.lt.f32.partialorder %v855_v8, 0.0004427343  ;;  %v880_v38 = vadd.f32 1.0, %v878_v7 }
 0x15c   : >> { %1941 = vlog2.f32 %v858_v33  ;;  %v862_v28 = vadd.f32 1.0, %v861_v61  ;;  %vm2673_vm11 = vcmp.lt.f32.partialorder %v864_v9, 0.0004427343  ;;  %v883_v39 = vmul.f32 -0.5, %v878_v7 }
 0x15d   : >> { %v854_v43 = vmul.f32 %v853_v2, %v2659_v57  ;;  %1943 = vlog2.f32 %v880_v38  ;;  %v886_v18 = vand.u32 2147483647, %v878_v7  ;;  %v889_v49 = vadd.f32 1.0, %v879_v41 }
 0x15e   : >> { %v863_v1 = vmul.f32 %v862_v28, %v2661_v59  ;;  %v884_v29 = vadd.f32 1.0, %v883_v39  ;;  %v892_v12 = vmul.f32 -0.5, %v879_v41  ;;  %v895_v62 = vand.u32 2147483647, %v879_v41 }
 0x15f   : >> { %vm2679_vm12 = vcmp.lt.f32.partialorder %v886_v18, 0.0004427343  ;;  %1945 = vlog2.f32 %v889_v49  ;;  %v912_v40 = vperm.slane %v2659_v57, 2  ;;  %v913_v4 = vperm.slane %v2661_v59, 2 }
 0x160   : >> { %v885_v30 = vmul.f32 %v884_v29, %v878_v7  ;;  %v893_v15 = vadd.f32 1.0, %v892_v12  ;;  %vm2685_vm13 = vcmp.lt.f32.partialorder %v895_v62, 0.0004427343  ;;  %v900_v54 = vperm.slane %v2659_v57, 0 }
 0x161   : >> { %v1940_v50 = vpop.eup %1939  ;;  %v914_v23 = vmul.f32 %v912_v40, %v2635_v11  ;;  %v915_v20 = vmul.f32 %v913_v4, %v2640_v26  ;;  %v901_v6 = vperm.slane %v2661_v59, 0  ;;  %v906_v48 = vperm.slane %v2659_v57, 1  ;;  %v3242_v40 = vld [vmem:[#allocation7_spill] sm:$0xff] }
 0x162   : >> { %v1942_v35 = vpop.eup %1941  ;;  %v851_v5 = vmul.f32 0.6931472, %v1940_v50  ;;  %v894_v53 = vmul.f32 %v893_v15, %v879_v41  ;;  %v902_v17 = vmul.f32 %v900_v54, %v2580_v45  ;;  %v907_v58 = vperm.slane %v2661_v59, 1  ;;  %v3243_v15 = vld [vmem:[#allocation6_spill] sm:$0xff] }
 0x163   : >> { %v1944_v60 = vpop.eup %1943  ;;  %v860_v8 = vmul.f32 0.6931472, %v1942_v35  ;;  %v2697_v7 = vadd.f32 %v914_v23, %v2619_v0  ;;  %v2700_v11 = vadd.f32 %v915_v20, %v2622_v19  ;;  %v903_v26 = vmul.f32 %v901_v6, %v2584_v31 }
 0x164   : >> { %v857_v33 = vsel %vm2669_vm10, %v854_v43, %v851_v5  ;;  %v882_v61 = vmul.f32 0.6931472, %v1944_v60  ;;  %v2706_v9 = vadd.f32 %v902_v17, %v2561_v21  ;;  %v908_v45 = vmul.f32 %v906_v48, %v2626_v14  ;;  %v3244_v5 = vld [vmem:[#allocation9_spill] sm:$0xff] }
 0x165   : >> { %v1946_v41 = vpop.eup %1945  ;;  %v866_v2 = vsel %vm2673_vm11, %v863_v1, %v860_v8  ;;  %v867_v0 = vmul.f32 7.0, %v857_v33  ;;  %v2712_v38 = vsub.f32 %v2697_v7, %v972_v32  ;;  %v2715_v19 = vsub.f32 %v2700_v11, %v972_v32 }
 0x166   : >> { %v868_v31 = vmul.f32 7.0, %v866_v2  ;;  %v888_v42 = vsel %vm2679_vm12, %v885_v30, %v882_v61  ;;  %v891_v28 = vmul.f32 0.6931472, %v1946_v41  ;;  %v2720_v21 = vadd.f32 %v903_v26, %v2564_v37 }
 0x167   : >> { %v869_v14 = vadd.f32 %v867_v0, %v2602_v10  ;;  %v976_v24 = vmul.f32 %v2712_v38, %v2712_v38  ;;  %v977_v39 = vmul.f32 %v2715_v19, %v2715_v19  ;;  %v909_v43 = vmul.f32 %v907_v58, %v2632_v44 }
 0x168   : >> { %v870_v18 = vadd.f32 %v868_v31, %v2628_v27  ;;  %v897_v49 = vsel %vm2685_vm13, %v894_v53, %v891_v28  ;;  %v2732_v1 = vadd.f32 %v908_v45, %v2612_v34  ;;  %v918_v37 = vperm.slane %v2659_v57, 3  ;;  %v1796_v34 = vld [vmem:[%s3209_s4 + $0x10] sm:$0xf] }
 0x169   : >> { %v2735_v29 = vadd.f32 %v888_v42, %v869_v14  ;;  %v978_v10 = vrot.slane %v976_v24, 4  ;;  %v984_v12 = vrot.slane %v977_v39, 4  ;;  %v2738_v62 = vadd.f32 %v909_v43, %v2616_v16  ;;  %1299 = vperm.xlu2 %1898, %v1796_v34  }
 0x16a   : >> { %v2740_v3 = vadd.f32 %v897_v49, %v870_v18  ;;  %v919_v44 = vperm.slane %v2661_v59, 3  ;;  %v920_v27 = vmul.f32 %v918_v37, %v2577_v46  ;;  %v2746_v4 = vsub.f32 %v2706_v9, %v3242_v40 }
 0x16b   : >> { %v979_v57 = vadd.f32 %v978_v10, %v976_v24  ;;  %v985_v30 = vadd.f32 %v984_v12, %v977_v39  ;;  %v2753_v16 = vsub.f32 %v2720_v21, %v3242_v40  ;;  %v2757_v47 = vsub.f32 %v2732_v1, %v3243_v15 }
 0x16c   : >> { %v921_v46 = vmul.f32 %v919_v44, %v2590_v36  ;;  %v2761_v59 = vadd.f32 %v920_v27, %v2558_v22  ;;  %v936_v54 = vmul.f32 %v2746_v4, %v2746_v4  ;;  %v2767_v50 = vsub.f32 %v2738_v62, %v3243_v15 }
 0x16d   : >> { %v980_v23 = vrot.slane %v979_v57, 2  ;;  %v986_v20 = vrot.slane %v985_v30, 2  ;;  %v937_v6 = vmul.f32 %v2753_v16, %v2753_v16  ;;  %v956_v48 = vmul.f32 %v2757_v47, %v2757_v47 }
 0x16e   : >> { %v2774_v36 = vadd.f32 %v921_v46, %v2572_v25  ;;  %v938_v22 = vrot.slane %v936_v54, 4  ;;  %v957_v35 = vmul.f32 %v2767_v50, %v2767_v50  ;;  %v2780_v53 = vsub.f32 %v2761_v59, %v3244_v5 }
 0x16f   : >> { %v981_v32 = vadd.f32 %v980_v23, %v979_v57  ;;  %v944_v17 = vrot.slane %v937_v6, 4  ;;  %v958_v58 = vrot.slane %v956_v48, 4  ;;  %v987_v33 = vadd.f32 %v986_v20, %v985_v30 }
 0x170   : >> { %v939_v60 = vadd.f32 %v938_v22, %v936_v54  ;;  %v964_v8 = vrot.slane %v957_v35, 4  ;;  %v2784_v26 = vsub.f32 %v2774_v36, %v3244_v5  ;;  %v996_v25 = vmul.f32 %v2780_v53, %v2780_v53 }
 0x171   : >> { %v945_v61 = vadd.f32 %v944_v17, %v937_v6  ;;  %v959_v45 = vadd.f32 %v958_v58, %v956_v48  ;;  %v982_v42 = vrot.slane %v981_v32, 1  ;;  %v988_v49 = vrot.slane %v987_v33, 1 }
 0x172   : >> { %v940_v41 = vrot.slane %v939_v60, 2  ;;  %v965_v2 = vadd.f32 %v964_v8, %v957_v35  ;;  %v997_v0 = vmul.f32 %v2784_v26, %v2784_v26  ;;  %v998_v31 = vrot.slane %v996_v25, 4 }
 0x173   : >> { %v946_v28 = vrot.slane %v945_v61, 2  ;;  %v960_v14 = vrot.slane %v959_v45, 2  ;;  %v983_v34 = vadd.f32 %v982_v42, %v981_v32  ;;  %v989_v20 = vadd.f32 %v988_v49, %v987_v33 }
 0x174   : >> { %v941_v24 = vadd.f32 %v940_v41, %v939_v60  ;;  %v966_v39 = vrot.slane %v965_v2, 2  ;;  %v999_v43 = vadd.f32 %v998_v31, %v996_v25  ;;  %v1004_v18 = vrot.slane %v997_v0, 4  ;;  %v1043_v25 = vpop.permute.xlu1 %1042 }
 0x175   : >> { %v947_v37 = vadd.f32 %v946_v28, %v945_v61  ;;  %v961_v10 = vadd.f32 %v960_v14, %v959_v45 }
 0x176   : >> { %v942_v12 = vrot.slane %v941_v24, 1  ;;  %v967_v44 = vadd.f32 %v966_v39, %v965_v2  ;;  %v1000_v27 = vrot.slane %v999_v43, 2  ;;  %v1005_v40 = vadd.f32 %v1004_v18, %v997_v0  ;;  %v1799_v2 = vld [vmem:[%s3209_s4 + $0x14] sm:$0xf] }
 0x177   : >> { %v948_v57 = vrot.slane %v947_v37, 1  ;;  %v962_v30 = vrot.slane %v961_v10, 1  ;;  %1512 = vperm.xlu1 %1897, %v1799_v2  }
 0x178   : >> { %v943_v15 = vadd.f32 %v942_v12, %v941_v24  ;;  %v968_v46 = vrot.slane %v967_v44, 1  ;;  %v1001_v54 = vadd.f32 %v1000_v27, %v999_v43  ;;  %v1006_v23 = vrot.slane %v1005_v40, 2 }
 0x179   : >> { %v949_v6 = vadd.f32 %v948_v57, %v947_v37  ;;  %v963_v48 = vadd.f32 %v962_v30, %v961_v10 }
 0x17a   : >> { %v969_v22 = vadd.f32 %v968_v46, %v967_v44  ;;  %v1002_v35 = vrot.slane %v1001_v54, 1  ;;  %v1007_v5 = vadd.f32 %v1006_v23, %v1005_v40 }
 0x17b   : >> { %v1010_v17 = vsel %vm368_vm0, %v943_v15, %v963_v48 }
 0x17c   : >> { %v1003_v58 = vadd.f32 %v1002_v35, %v1001_v54  ;;  %v1008_v60 = vrot.slane %v1007_v5, 1  ;;  %v1011_v8 = vsel %vm368_vm0, %v949_v6, %v969_v22  ;;  %v1012_v32 = vsel %vm371_vm1, %v1010_v17, %v983_v34  ;;  %v2799_v28 = vpop.permute.xlu1 %1164 }
 0x17d   : >> { %v1013_v61 = vsel %vm371_vm1, %v1011_v8, %v989_v20 }
 0x17e   : >> { %v1009_v45 = vadd.f32 %v1008_v60, %v1007_v5  ;;  %v1014_v41 = vsel %vm374_vm2, %v1012_v32, %v1003_v58 }
 0x17f   : >> { %1947 = vrsqrt.f32 %v1014_v41  ;;  %vm1023_vm14 = vcmp.eq.f32.partialorder %v1014_v41, inf  ;;  %v1026_v27 = vand.u32 2147483648, %v1014_v41  ;;  %vm1025_vm15 = vcmp.eq.f32.partialorder %v1014_v41, 0.0 }
 0x180   : >> { %v1015_v33 = vsel %vm374_vm2, %v1013_v61, %v1009_v45 }
 0x181   : >> { %1949 = vrsqrt.f32 %v1015_v33  ;;  %vm1035_vm3 = vcmp.eq.f32.partialorder %v1015_v33, inf  ;;  %v1038_v15 = vand.u32 2147483648, %v1015_v33  ;;  %vm1037_vm4 = vcmp.eq.f32.partialorder %v1015_v33, 0.0 }
 0x184   : >> { %v1205_v40 = vpop.permute.xlu1 %1204 }
 0x185   : >> { %v1948_v0 = vpop.eup %1947 }
 0x186   : >> { %v1017_v31 = vmul.f32 %v1948_v0, %v1014_v41 }
 0x187   : >> { %v1950_v42 = vpop.eup %1949 }
 0x188   : >> { %v1018_v14 = vmul.f32 %v1948_v0, %v1017_v31  ;;  %v1029_v24 = vmul.f32 %v1950_v42, %v1015_v33 }
 0x18a   : >> { %v1019_v39 = vmul.f32 0.5, %v1018_v14  ;;  %v1030_v43 = vmul.f32 %v1950_v42, %v1029_v24 }
 0x18c   : >> { %v1020_v18 = vsub.f32 1.5, %v1019_v39  ;;  %v1031_v49 = vmul.f32 0.5, %v1030_v43  ;;  %v2801_v6 = vpop.permute.xlu1 %1357 }
 0x18e   : >> { %v1021_v37 = vmul.f32 %v1948_v0, %v1020_v18  ;;  %v1032_v10 = vsub.f32 1.5, %v1031_v49 }
 0x190   : >> { %v1022_v12 = vmul.f32 %v1021_v37, %v1014_v41  ;;  %v1033_v44 = vmul.f32 %v1950_v42, %v1032_v10 }
 0x192   : >> { %v1024_v34 = vsel %vm1023_vm14, %v1014_v41, %v1022_v12  ;;  %v1034_v57 = vmul.f32 %v1033_v44, %v1015_v33 }
 0x193   : >> { %v1027_v30 = vsel %vm1025_vm15, %v1026_v27, %v1024_v34 }
 0x194   : >> { %v1036_v46 = vsel %vm1035_vm3, %v1015_v33, %v1034_v57  ;;  %v1045_v54 = vadd.f32 %v1043_v25, %v1027_v30  ;;  %v2818_v33 = vpop.permute.xlu1 %1397 }
 0x195   : >> { %v1039_v23 = vsel %vm1037_vm4, %v1038_v15, %v1036_v46 }
 0x196   : >> { %v1046_v20 = vadd.f32 %v1043_v25, %v1039_v23  ;;  %1951 = vrcp.f32 %v1045_v54 }
 0x198   : >> { %1953 = vrcp.f32 %v1046_v20 }
 0x19c   : >> { %v1952_v48 = vpop.eup %1951 }
 0x19d   : >> { %v1049_v22 = vmul.f32 %v1952_v48, %v1045_v54 }
 0x19e   : >> { %v1954_v35 = vpop.eup %1953 }
 0x19f   : >> { %v1050_v5 = vmul.f32 %v1954_v35, %v1046_v20  ;;  %v1051_v17 = vsub.f32 2.0, %v1049_v22  ;;  %v2905_v20 = vpop.permute.xlu1 %1468 }
 0x1a1   : >> { %v1052_v58 = vsub.f32 2.0, %v1050_v5  ;;  %v2803_v60 = vmul.f32 %v1952_v48, %v1051_v17 }
 0x1a3   : >> { %v2805_v8 = vmul.f32 %v1954_v35, %v1052_v58  ;;  %v2809_v32 = vmul.f32 %v2452_v51, %v2803_v60 }
 0x1a5   : >> { %v2813_v25 = vmul.f32 %v2452_v51, %v2805_v8  ;;  %v1119_v61 = vperm.slane %v2809_v32, 1  ;;  %v1113_v45 = vperm.slane %v2809_v32, 0  ;;  %v1125_v41 = vperm.slane %v2809_v32, 2 }
 0x1a6   : >> { %v1131_v2 = vperm.slane %v2809_v32, 3  ;;  %v2822_v0 = vadd.f32 1.0, %v2809_v32  ;;  %v2825_v31 = vmul.f32 -0.5, %v2809_v32 }
 0x1a7   : >> { %v1120_v42 = vperm.slane %v2813_v25, 1  ;;  %v1121_v51 = vmul.f32 %v1119_v61, %v2757_v47  ;;  %v1114_v14 = vperm.slane %v2813_v25, 0  ;;  %v1115_v24 = vmul.f32 %v1113_v45, %v2746_v4 }
 0x1a8   : >> { %v1126_v39 = vperm.slane %v2813_v25, 2  ;;  %v1127_v43 = vmul.f32 %v1125_v41, %v2712_v38  ;;  %v1132_v18 = vperm.slane %v2813_v25, 3  ;;  %v1133_v49 = vmul.f32 %v1131_v2, %v2780_v53 }
 0x1a9   : >> { %v1122_v37 = vmul.f32 %v1120_v42, %v2767_v50  ;;  %v2837_v10 = vadd.f32 %v1121_v51, %v2732_v1  ;;  %v1116_v12 = vmul.f32 %v1114_v14, %v2753_v16  ;;  %v2841_v47 = vadd.f32 %v1115_v24, %v2706_v9  ;;  %v3245_v16 = vld [vmem:[#allocation8_spill] sm:$0xff] }
 0x1aa   : >> { %v1128_v4 = vmul.f32 %v1126_v39, %v2715_v19  ;;  %v2845_v44 = vadd.f32 %v1127_v43, %v2697_v7  ;;  %v1134_v38 = vmul.f32 %v1132_v18, %v2784_v26  ;;  %v2849_v27 = vadd.f32 %v1133_v49, %v2761_v59 }
 0x1ab   : >> { %v2852_v50 = vadd.f32 %v1122_v37, %v2738_v62  ;;  %v2856_v1 = vsub.f32 %v2837_v10, %v2799_v28  ;;  %v2859_v9 = vadd.f32 %v1116_v12, %v2720_v21  ;;  %v2863_v19 = vsub.f32 %v2841_v47, %v3245_v16 }
 0x1ac   : >> { %v2866_v7 = vadd.f32 %v1128_v4, %v2700_v11  ;;  %v2869_v59 = vadd.f32 %v1134_v38, %v2774_v36  ;;  %v2873_v62 = vsub.f32 %v2845_v44, %v2466_v55  ;;  %v2876_v53 = vsub.f32 %v2849_v27, %v1205_v40 }
 0x1ad   : >> { %v2880_v21 = vsub.f32 %v2852_v50, %v2799_v28  ;;  %v1169_v26 = vmul.f32 %v2856_v1, %v2856_v1  ;;  %v2886_v11 = vsub.f32 %v2859_v9, %v3245_v16  ;;  %v1149_v36 = vmul.f32 %v2863_v19, %v2863_v19 }
 0x1ae   : >> { %v2892_v34 = vsub.f32 %v2866_v7, %v2466_v55  ;;  %v1189_v57 = vmul.f32 %v2873_v62, %v2873_v62  ;;  %v2897_v28 = vsub.f32 %v2869_v59, %v1205_v40  ;;  %v1209_v30 = vmul.f32 %v2876_v53, %v2876_v53 }
 0x1af   : >> { %v1170_v15 = vmul.f32 %v2880_v21, %v2880_v21  ;;  %v1171_v46 = vrot.slane %v1169_v26, 4  ;;  %v1150_v54 = vmul.f32 %v2886_v11, %v2886_v11  ;;  %v1151_v23 = vrot.slane %v1149_v36, 4 }
 0x1b0   : >> { %v1190_v55 = vmul.f32 %v2892_v34, %v2892_v34  ;;  %v1191_v48 = vrot.slane %v1189_v57, 4  ;;  %v1210_v40 = vmul.f32 %v2897_v28, %v2897_v28  ;;  %v1211_v22 = vrot.slane %v1209_v30, 4 }
 0x1b1   : >> { %v1172_v35 = vadd.f32 %v1171_v46, %v1169_v26  ;;  %v1177_v5 = vrot.slane %v1170_v15, 4  ;;  %v1152_v17 = vadd.f32 %v1151_v23, %v1149_v36  ;;  %v1157_v58 = vrot.slane %v1150_v54, 4 }
 0x1b2   : >> { %v1192_v61 = vadd.f32 %v1191_v48, %v1189_v57  ;;  %v1197_v45 = vrot.slane %v1190_v55, 4  ;;  %v1212_v41 = vadd.f32 %v1211_v22, %v1209_v30  ;;  %v1217_v2 = vrot.slane %v1210_v40, 4 }
 0x1b3   : >> { %v1173_v42 = vrot.slane %v1172_v35, 2  ;;  %v1178_v51 = vadd.f32 %v1177_v5, %v1170_v15  ;;  %v1153_v14 = vrot.slane %v1152_v17, 2  ;;  %v1158_v24 = vadd.f32 %v1157_v58, %v1150_v54 }
 0x1b4   : >> { %v1193_v39 = vrot.slane %v1192_v61, 2  ;;  %v1198_v43 = vadd.f32 %v1197_v45, %v1190_v55  ;;  %v1213_v18 = vrot.slane %v1212_v41, 2  ;;  %v1218_v49 = vadd.f32 %v1217_v2, %v1210_v40 }
 0x1b5   : >> { %v1174_v37 = vadd.f32 %v1173_v42, %v1172_v35  ;;  %v1179_v12 = vrot.slane %v1178_v51, 2  ;;  %v1154_v4 = vadd.f32 %v1153_v14, %v1152_v17  ;;  %v1159_v38 = vrot.slane %v1158_v24, 2  ;;  %v1087_v35 = vpop.permute.xlu1 %1086 }
 0x1b6   : >> { %v1194_v16 = vadd.f32 %v1193_v39, %v1192_v61  ;;  %v1199_v26 = vrot.slane %v1198_v43, 2  ;;  %v1214_v36 = vadd.f32 %v1213_v18, %v1212_v41  ;;  %v1219_v46 = vrot.slane %v1218_v49, 2 }
 0x1b7   : >> { %v1175_v57 = vrot.slane %v1174_v37, 1  ;;  %v1180_v23 = vadd.f32 %v1179_v12, %v1178_v51  ;;  %v1155_v30 = vrot.slane %v1154_v4, 1  ;;  %v1160_v48 = vadd.f32 %v1159_v38, %v1158_v24 }
 0x1b8   : >> { %v1195_v22 = vrot.slane %v1194_v16, 1  ;;  %v1200_v15 = vadd.f32 %v1199_v26, %v1198_v43  ;;  %v1215_v5 = vrot.slane %v1214_v36, 1  ;;  %v1220_v54 = vadd.f32 %v1219_v46, %v1218_v49 }
 0x1b9   : >> { %v1176_v58 = vadd.f32 %v1175_v57, %v1174_v37  ;;  %v1181_v55 = vrot.slane %v1180_v23, 1  ;;  %v1156_v45 = vadd.f32 %v1155_v30, %v1154_v4  ;;  %v1161_v40 = vrot.slane %v1160_v48, 1 }
 0x1ba   : >> { %v1196_v2 = vadd.f32 %v1195_v22, %v1194_v16  ;;  %v1201_v17 = vrot.slane %v1200_v15, 1  ;;  %v1216_v42 = vadd.f32 %v1215_v5, %v1214_v36  ;;  %v1221_v61 = vrot.slane %v1220_v54, 1 }
 0x1bb   : >> { %v1182_v14 = vadd.f32 %v1181_v55, %v1180_v23  ;;  %v1162_v41 = vadd.f32 %v1161_v40, %v1160_v48  ;;  %v1223_v39 = vsel %vm368_vm0, %v1156_v45, %v1176_v58  ;;  %1955 = vlog2.f32 %v2822_v0 }
 0x1bc   : >> { %v1202_v51 = vadd.f32 %v1201_v17, %v1200_v15  ;;  %v1225_v24 = vsel %vm371_vm1, %v1223_v39, %v1196_v2  ;;  %v1089_v43 = vmul.f32 %v1087_v35, %v2803_v60  ;;  %v1222_v18 = vadd.f32 %v1221_v61, %v1220_v54 }
 0x1bd   : >> { %v1224_v49 = vsel %vm368_vm0, %v1162_v41, %v1182_v14  ;;  %v2917_v37 = vsel %vm374_vm2, %v1225_v24, %v1216_v42  ;;  %v1071_v12 = vadd.f32 1.0, %v2813_v25  ;;  %v1066_v38 = vadd.f32 1.0, %v2825_v31 }
 0x1be   : >> { %v1226_v4 = vsel %vm371_vm1, %v1224_v49, %v1202_v51  ;;  %1957 = vrsqrt.f32 %v2917_v37  ;;  %v1068_v16 = vand.u32 2147483647, %v2809_v32  ;;  %v1074_v36 = vmul.f32 -0.5, %v2813_v25 }
 0x1bf   : >> { %v2924_v0 = vsel %vm374_vm2, %v1226_v4, %v1222_v18  ;;  %1959 = vlog2.f32 %v1071_v12  ;;  %v1090_v46 = vmul.f32 %v1087_v35, %v2805_v8  ;;  %v1091_v57 = vmul.f32 %v1089_v43, %v2803_v60 }
 0x1c0   : >> { %1961 = vrsqrt.f32 %v2924_v0  ;;  %v1067_v30 = vmul.f32 %v1066_v38, %v2809_v32  ;;  %v1077_v31 = vand.u32 2147483647, %v2813_v25  ;;  %vm1069_vm5 = vcmp.lt.f32.partialorder %v1068_v16, 0.0004427343 }
 0x1c1   : >> { %v1956_v26 = vpop.eup %1955  ;;  %v1075_v48 = vadd.f32 1.0, %v1074_v36  ;;  %v1092_v22 = vmul.f32 %v1090_v46, %v2805_v8  ;;  %v1093_v15 = vadd.f32 1.0, %v1091_v57  ;;  %v1096_v58 = vmul.f32 -0.5, %v1091_v57 }
 0x1c2   : >> { %v1064_v23 = vmul.f32 0.6931472, %v1956_v26  ;;  %vm1078_vm6 = vcmp.lt.f32.partialorder %v1077_v31, 0.0004427343  ;;  %v1099_v43 = vand.u32 2147483647, %v1091_v57 }
 0x1c3   : >> { %1963 = vlog2.f32 %v1093_v15  ;;  %v1076_v2 = vmul.f32 %v1075_v48, %v2813_v25  ;;  %v1102_v32 = vadd.f32 1.0, %v1092_v22  ;;  %v1105_v61 = vmul.f32 -0.5, %v1092_v22 }
 0x1c4   : >> { %v1958_v5 = vpop.eup %1957  ;;  %v1070_v54 = vsel %vm1069_vm5, %v1067_v30, %v1064_v23  ;;  %v1097_v41 = vadd.f32 1.0, %v1096_v58  ;;  %v1108_v26 = vand.u32 2147483647, %v1092_v22  ;;  %vm1100_vm7 = vcmp.lt.f32.partialorder %v1099_v43, 0.0004427343 }
 0x1c5   : >> { %v1960_v55 = vpop.eup %1959  ;;  %v1230_v45 = vmul.f32 %v1958_v5, %v2917_v37  ;;  %v1080_v40 = vmul.f32 7.0, %v1070_v54  ;;  %1965 = vlog2.f32 %v1102_v32  ;;  %v1106_v18 = vadd.f32 1.0, %v1105_v61 }
 0x1c6   : >> { %v1962_v35 = vpop.eup %1961  ;;  %v1073_v60 = vmul.f32 0.6931472, %v1960_v55  ;;  %v1098_v16 = vmul.f32 %v1097_v41, %v1091_v57  ;;  %vm1236_vm8 = vcmp.eq.f32.partialorder %v2917_v37, inf  ;;  %v1239_v58 = vand.u32 2147483648, %v2917_v37 }
 0x1c7   : >> { %v1231_v17 = vmul.f32 %v1958_v5, %v1230_v45  ;;  %v1242_v42 = vmul.f32 %v1962_v35, %v2924_v0  ;;  %v1082_v8 = vadd.f32 %v1080_v40, %v2735_v29  ;;  %v1107_v30 = vmul.f32 %v1106_v18, %v1092_v22 }
 0x1c8   : >> { %v1079_v14 = vsel %vm1078_vm6, %v1076_v2, %v1073_v60  ;;  %vm1109_vm9 = vcmp.lt.f32.partialorder %v1108_v26, 0.0004427343  ;;  %vm1238_vm10 = vcmp.eq.f32.partialorder %v2917_v37, 0.0  ;;  %vm1248_vm11 = vcmp.eq.f32.partialorder %v2924_v0, inf }
 0x1c9   : >> { %v1232_v39 = vmul.f32 0.5, %v1231_v17  ;;  %v1243_v51 = vmul.f32 %v1962_v35, %v1242_v42  ;;  %v1081_v24 = vmul.f32 7.0, %v1079_v14  ;;  %v1964_v49 = vpop.eup %1963  ;;  %v1251_v22 = vand.u32 2147483648, %v2924_v0 }
 0x1ca   : >> { %v1095_v38 = vmul.f32 0.6931472, %v1964_v49  ;;  %vm1250_vm12 = vcmp.eq.f32.partialorder %v2924_v0, 0.0 }
 0x1cb   : >> { %v1233_v12 = vsub.f32 1.5, %v1232_v39  ;;  %v1244_v4 = vmul.f32 0.5, %v1243_v51  ;;  %v1083_v25 = vadd.f32 %v1081_v24, %v2740_v3  ;;  %v1966_v29 = vpop.eup %1965 }
 0x1cc   : >> { %v1101_v23 = vsel %vm1100_vm7, %v1098_v16, %v1095_v38  ;;  %v1104_v15 = vmul.f32 0.6931472, %v1966_v29 }
 0x1cd   : >> { %v1234_v36 = vmul.f32 %v1958_v5, %v1233_v12  ;;  %v1245_v46 = vsub.f32 1.5, %v1244_v4  ;;  %v2940_v54 = vadd.f32 %v1101_v23, %v1082_v8 }
 0x1ce   : >> { %v1110_v5 = vsel %vm1109_vm9, %v1107_v30, %v1104_v15  ;;  %vm1585_vm9 = vcmask 1043456  }
 0x1cf   : >> { %v1235_v31 = vmul.f32 %v1234_v36, %v2917_v37  ;;  %v1246_v48 = vmul.f32 %v1962_v35, %v1245_v46  ;;  %v2949_v45 = vadd.f32 %v1110_v5, %v1083_v25 }
 0x1d1   : >> { %v1237_v3 = vsel %vm1236_vm8, %v2917_v37, %v1235_v31  ;;  %v1247_v57 = vmul.f32 %v1246_v48, %v2924_v0 }
 0x1d2   : >> { %v1240_v55 = vsel %vm1238_vm10, %v1239_v58, %v1237_v3 }
 0x1d3   : >> { %v1249_v40 = vsel %vm1248_vm11, %v2924_v0, %v1247_v57  ;;  %v1258_v35 = vadd.f32 %v2483_v56, %v1240_v55 }
 0x1d4   : >> { %v1252_v60 = vsel %vm1250_vm12, %v1251_v22, %v1249_v40 }
 0x1d5   : >> { %v1259_v2 = vadd.f32 %v2483_v56, %v1252_v60  ;;  %1967 = vrcp.f32 %v1258_v35 }
 0x1d7   : >> { %1969 = vrcp.f32 %v1259_v2 }
 0x1db   : >> { %v1968_v37 = vpop.eup %1967 }
 0x1dc   : >> { %v1262_v32 = vmul.f32 %v1968_v37, %v1258_v35 }
 0x1dd   : >> { %v1970_v17 = vpop.eup %1969 }
 0x1de   : >> { %v1263_v42 = vmul.f32 %v1970_v17, %v1259_v2  ;;  %v1264_v8 = vsub.f32 2.0, %v1262_v32 }
 0x1e0   : >> { %v1265_v61 = vsub.f32 2.0, %v1263_v42  ;;  %v2955_v14 = vmul.f32 %v1968_v37, %v1264_v8 }
 0x1e2   : >> { %v2957_v41 = vmul.f32 %v1970_v17, %v1265_v61  ;;  %v2961_v0 = vmul.f32 %v2450_v13, %v2955_v14 }
 0x1e4   : >> { %v2965_v39 = vmul.f32 %v2450_v13, %v2957_v41  ;;  %v1344_v56 = vperm.slane %v2961_v0, 3  ;;  %v1326_v51 = vperm.slane %v2961_v0, 0  ;;  %v1332_v24 = vperm.slane %v2961_v0, 1 }
 0x1e5   : >> { %v1338_v43 = vperm.slane %v2961_v0, 2  ;;  %v2972_v18 = vadd.f32 1.0, %v2961_v0 }
 0x1e6   : >> { %v1345_v49 = vperm.slane %v2965_v39, 3  ;;  %v1346_v12 = vmul.f32 %v1344_v56, %v2876_v53  ;;  %v1327_v4 = vperm.slane %v2965_v39, 0  ;;  %v1328_v13 = vmul.f32 %v1326_v51, %v2863_v19 }
 0x1e7   : >> { %v1333_v25 = vperm.slane %v2965_v39, 1  ;;  %v1334_v38 = vmul.f32 %v1332_v24, %v2856_v1  ;;  %v1339_v16 = vperm.slane %v2965_v39, 2  ;;  %v1340_v26 = vmul.f32 %v1338_v43, %v2873_v62 }
 0x1e8   : >> { %v1347_v36 = vmul.f32 %v1345_v49, %v2897_v28  ;;  %v2984_v46 = vadd.f32 %v1346_v12, %v2849_v27  ;;  %v1329_v29 = vmul.f32 %v1327_v4, %v2886_v11  ;;  %v2988_v53 = vadd.f32 %v1328_v13, %v2841_v47 }
 0x1e9   : >> { %v1335_v19 = vmul.f32 %v1333_v25, %v2880_v21  ;;  %v2992_v23 = vadd.f32 %v1334_v38, %v2837_v10  ;;  %v1341_v1 = vmul.f32 %v1339_v16, %v2892_v34  ;;  %v2996_v30 = vadd.f32 %v1340_v26, %v2845_v44 }
 0x1ea   : >> { %v2999_v62 = vadd.f32 %v1347_v36, %v2869_v59  ;;  %v3003_v27 = vsub.f32 %v2984_v46, %v2528_v63  ;;  %v3006_v47 = vadd.f32 %v1329_v29, %v2859_v9  ;;  %v3010_v21 = vsub.f32 %v2988_v53, %v2801_v6 }
 0x1eb   : >> { %v3013_v10 = vadd.f32 %v1335_v19, %v2852_v50  ;;  %v3017_v44 = vsub.f32 %v2992_v23, %v2506_v52  ;;  %v3020_v59 = vadd.f32 %v1341_v1, %v2866_v7  ;;  %v3024_v11 = vsub.f32 %v2996_v30, %v2818_v33 }
 0x1ec   : >> { %v3028_v9 = vsub.f32 %v2999_v62, %v2528_v63  ;;  %v1422_v34 = vmul.f32 %v3003_v27, %v3003_v27  ;;  %v3034_v50 = vsub.f32 %v3006_v47, %v2801_v6  ;;  %v1362_v28 = vmul.f32 %v3010_v21, %v3010_v21 }
 0x1ed   : >> { %v3040_v7 = vsub.f32 %v3013_v10, %v2506_v52  ;;  %v1382_v31 = vmul.f32 %v3017_v44, %v3017_v44  ;;  %v3046_v63 = vsub.f32 %v3020_v59, %v2818_v33  ;;  %v1402_v48 = vmul.f32 %v3024_v11, %v3024_v11 }
 0x1ee   : >> { %v1423_v6 = vmul.f32 %v3028_v9, %v3028_v9  ;;  %v1424_v15 = vrot.slane %v1422_v34, 4  ;;  %v1363_v58 = vmul.f32 %v3034_v50, %v3034_v50  ;;  %v1364_v3 = vrot.slane %v1362_v28, 4 }
 0x1ef   : >> { %v1383_v52 = vmul.f32 %v3040_v7, %v3040_v7  ;;  %v1384_v57 = vrot.slane %v1382_v31, 4  ;;  %v1403_v5 = vmul.f32 %v3046_v63, %v3046_v63  ;;  %v1404_v33 = vrot.slane %v1402_v48, 4 }
 0x1f0   : >> { %v1425_v55 = vadd.f32 %v1424_v15, %v1422_v34  ;;  %v1430_v22 = vrot.slane %v1423_v6, 4  ;;  %v1365_v40 = vadd.f32 %v1364_v3, %v1362_v28  ;;  %v1370_v35 = vrot.slane %v1363_v58, 4 }
 0x1f1   : >> { %v1385_v60 = vadd.f32 %v1384_v57, %v1382_v31  ;;  %v1390_v2 = vrot.slane %v1383_v52, 4  ;;  %v1405_v37 = vadd.f32 %v1404_v33, %v1402_v48  ;;  %v1410_v32 = vrot.slane %v1403_v5, 4 }
 0x1f2   : >> { %v1426_v17 = vrot.slane %v1425_v55, 2  ;;  %v1431_v42 = vadd.f32 %v1430_v22, %v1423_v6  ;;  %v1366_v8 = vrot.slane %v1365_v40, 2  ;;  %v1371_v61 = vadd.f32 %v1370_v35, %v1363_v58 }
 0x1f3   : >> { %v1386_v56 = vrot.slane %v1385_v60, 2  ;;  %v1391_v51 = vadd.f32 %v1390_v2, %v1383_v52  ;;  %v1406_v24 = vrot.slane %v1405_v37, 2  ;;  %v1411_v43 = vadd.f32 %v1410_v32, %v1403_v5 }
 0x1f4   : >> { %v1427_v49 = vadd.f32 %v1426_v17, %v1425_v55  ;;  %v1432_v12 = vrot.slane %v1431_v42, 2  ;;  %v1367_v4 = vadd.f32 %v1366_v8, %v1365_v40  ;;  %v1372_v13 = vrot.slane %v1371_v61, 2  ;;  %v1300_v55 = vpop.permute.xlu2 %1299 }
 0x1f5   : >> { %v1387_v25 = vadd.f32 %v1386_v56, %v1385_v60  ;;  %v1392_v38 = vrot.slane %v1391_v51, 2  ;;  %v1407_v16 = vadd.f32 %v1406_v24, %v1405_v37  ;;  %v1412_v26 = vrot.slane %v1411_v43, 2 }
 0x1f6   : >> { %v1428_v36 = vrot.slane %v1427_v49, 1  ;;  %v1433_v29 = vadd.f32 %v1432_v12, %v1431_v42  ;;  %v1368_v19 = vrot.slane %v1367_v4, 1  ;;  %v1373_v1 = vadd.f32 %v1372_v13, %v1371_v61 }
 0x1f7   : >> { %v1388_v34 = vrot.slane %v1387_v25, 1  ;;  %v1393_v28 = vadd.f32 %v1392_v38, %v1391_v51  ;;  %v1408_v31 = vrot.slane %v1407_v16, 1  ;;  %v1413_v48 = vadd.f32 %v1412_v26, %v1411_v43 }
 0x1f8   : >> { %v1434_v6 = vrot.slane %v1433_v29, 1  ;;  %v1369_v15 = vadd.f32 %v1368_v19, %v1367_v4  ;;  %v1374_v58 = vrot.slane %v1373_v1, 1  ;;  %v1278_v3 = vmul.f32 -0.5, %v2961_v0 }
 0x1f9   : >> { %v1389_v52 = vadd.f32 %v1388_v34, %v1387_v25  ;;  %v1394_v57 = vrot.slane %v1393_v28, 1  ;;  %v1409_v5 = vadd.f32 %v1408_v31, %v1407_v16  ;;  %v1414_v33 = vrot.slane %v1413_v48, 1 }
 0x1fa   : >> { %v1375_v22 = vadd.f32 %v1374_v58, %v1373_v1  ;;  %1971 = vlog2.f32 %v2972_v18  ;;  %v1429_v40 = vadd.f32 %v1428_v36, %v1427_v49  ;;  %v1281_v32 = vand.u32 2147483647, %v2961_v0 }
 0x1fb   : >> { %v1395_v35 = vadd.f32 %v1394_v57, %v1393_v28  ;;  %v1436_v60 = vsel %vm368_vm0, %v1369_v15, %v1389_v52  ;;  %v1415_v2 = vadd.f32 %v1414_v33, %v1413_v48  ;;  %v1284_v17 = vadd.f32 1.0, %v2965_v39 }
 0x1fc   : >> { %v1438_v37 = vsel %vm371_vm1, %v1436_v60, %v1409_v5  ;;  %v1302_v42 = vmul.f32 %v1300_v55, %v2955_v14  ;;  %v1435_v8 = vadd.f32 %v1434_v6, %v1433_v29  ;;  %v1279_v18 = vadd.f32 1.0, %v1278_v3 }
 0x1fd   : >> { %v1437_v61 = vsel %vm368_vm0, %v1375_v22, %v1395_v35  ;;  %v3067_v56 = vsel %vm374_vm2, %v1438_v37, %v1429_v40  ;;  %v1287_v24 = vmul.f32 -0.5, %v2965_v39  ;;  %v1303_v43 = vmul.f32 %v1300_v55, %v2957_v41 }
 0x1fe   : >> { %v1439_v51 = vsel %vm371_vm1, %v1437_v61, %v1415_v2  ;;  %1973 = vrsqrt.f32 %v3067_v56  ;;  %v1280_v13 = vmul.f32 %v1279_v18, %v2961_v0  ;;  %v1304_v25 = vmul.f32 %v1302_v42, %v2955_v14 }
 0x1ff   : >> { %v3074_v49 = vsel %vm374_vm2, %v1439_v51, %v1435_v8  ;;  %1975 = vlog2.f32 %v1284_v17  ;;  %vm1282_vm0 = vcmp.lt.f32.partialorder %v1281_v32, 0.0004427343  ;;  %v1288_v38 = vadd.f32 1.0, %v1287_v24 }
 0x200   : >> { %v1972_v12 = vpop.eup %1971  ;;  %1977 = vrsqrt.f32 %v3074_v49  ;;  %v1305_v16 = vmul.f32 %v1303_v43, %v2957_v41  ;;  %v1290_v36 = vand.u32 2147483647, %v2965_v39  ;;  %v1306_v29 = vadd.f32 1.0, %v1304_v25 }
 0x201   : >> { %v1277_v4 = vmul.f32 0.6931472, %v1972_v12  ;;  %v1309_v34 = vmul.f32 -0.5, %v1304_v25  ;;  %v1289_v14 = vmul.f32 %v1288_v38, %v2965_v39  ;;  %v1312_v5 = vand.u32 2147483647, %v1304_v25 }
 0x202   : >> { %v1315_v28 = vadd.f32 1.0, %v1305_v16  ;;  %1979 = vlog2.f32 %v1306_v29  ;;  %v1318_v6 = vmul.f32 -0.5, %v1305_v16  ;;  %vm1291_vm1 = vcmp.lt.f32.partialorder %v1290_v36, 0.0004427343 }
 0x203   : >> { %v1283_v26 = vsel %vm1282_vm0, %v1280_v13, %v1277_v4  ;;  %v1310_v57 = vadd.f32 1.0, %v1309_v34  ;;  %v1321_v35 = vand.u32 2147483647, %v1305_v16  ;;  %vm1313_vm2 = vcmp.lt.f32.partialorder %v1312_v5, 0.0004427343 }
 0x204   : >> { %v1974_v19 = vpop.eup %1973  ;;  %v1293_v1 = vmul.f32 7.0, %v1283_v26  ;;  %1981 = vlog2.f32 %v1315_v28  ;;  %v1319_v40 = vadd.f32 1.0, %v1318_v6  ;;  %vm1449_vm14 = vcmp.eq.f32.partialorder %v3067_v56, inf }
 0x205   : >> { %v1976_v31 = vpop.eup %1975  ;;  %v1443_v48 = vmul.f32 %v1974_v19, %v3067_v56  ;;  %v1311_v17 = vmul.f32 %v1310_v57, %v1304_v25  ;;  %vm1322_vm13 = vcmp.lt.f32.partialorder %v1321_v35, 0.0004427343  ;;  %vm1451_vm15 = vcmp.eq.f32.partialorder %v3067_v56, 0.0 }
 0x206   : >> { %v1978_v0 = vpop.eup %1977  ;;  %v1286_v15 = vmul.f32 0.6931472, %v1976_v31  ;;  %v1295_v58 = vadd.f32 %v1293_v1, %v2940_v54  ;;  %v1320_v18 = vmul.f32 %v1319_v40, %v1305_v16  ;;  %vm1461_vm3 = vcmp.eq.f32.partialorder %v3074_v49, inf }
 0x207   : >> { %v1444_v41 = vmul.f32 %v1974_v19, %v1443_v48  ;;  %v1455_v3 = vmul.f32 %v1978_v0, %v3074_v49  ;;  %v1464_v26 = vand.u32 2147483648, %v3074_v49  ;;  %vm1463_vm4 = vcmp.eq.f32.partialorder %v3074_v49, 0.0 }
 0x208   : >> { %v1292_v52 = vsel %vm1291_vm1, %v1289_v14, %v1286_v15  ;;  %v1980_v60 = vpop.eup %1979  ;;  %v1484_v15 = vpop.permute.xlu0 %1483 }
 0x209   : >> { %v1445_v33 = vmul.f32 0.5, %v1444_v41  ;;  %v1456_v55 = vmul.f32 %v1978_v0, %v1455_v3  ;;  %v1294_v22 = vmul.f32 7.0, %v1292_v52  ;;  %v1308_v54 = vmul.f32 0.6931472, %v1980_v60 }
 0x20a   : >> { %v1982_v32 = vpop.eup %1981 }
 0x20b   : >> { %v1446_v2 = vsub.f32 1.5, %v1445_v33  ;;  %v1457_v37 = vmul.f32 0.5, %v1456_v55  ;;  %v1296_v39 = vadd.f32 %v1294_v22, %v2949_v45  ;;  %v1317_v61 = vmul.f32 0.6931472, %v1982_v32 }
 0x20c   : >> { %v1314_v51 = vsel %vm1313_vm2, %v1311_v17, %v1308_v54  ;;  %v1452_v45 = vand.u32 2147483648, %v3067_v56  ;;  %v1513_v54 = vpop.permute.xlu1 %1512 }
 0x20d   : >> { %v1447_v42 = vmul.f32 %v1974_v19, %v1446_v2  ;;  %v1458_v8 = vsub.f32 1.5, %v1457_v37  ;;  %v1323_v12 = vsel %vm1322_vm13, %v1320_v18, %v1317_v61  ;;  %v3087_v4 = vadd.f32 %v1314_v51, %v1295_v58 }
 0x20e   : >> { %v3091_v13 = vadd.f32 %v1323_v12, %v1296_v39 }
 0x20f   : >> { %v1448_v24 = vmul.f32 %v1447_v42, %v3067_v56  ;;  %v1459_v43 = vmul.f32 %v1978_v0, %v1458_v8 }
 0x211   : >> { %v1450_v25 = vsel %vm1449_vm14, %v3067_v56, %v1448_v24  ;;  %v1460_v38 = vmul.f32 %v1459_v43, %v3074_v49 }
 0x212   : >> { %v1453_v16 = vsel %vm1451_vm15, %v1452_v45, %v1450_v25 }
 0x213   : >> { %v1462_v36 = vsel %vm1461_vm3, %v3074_v49, %v1460_v38  ;;  %v1471_v29 = vadd.f32 %v2905_v20, %v1453_v16 }
 0x214   : >> { %v1465_v19 = vsel %vm1463_vm4, %v1464_v26, %v1462_v36 }
 0x215   : >> { %v1472_v1 = vadd.f32 %v2905_v20, %v1465_v19  ;;  %1983 = vrcp.f32 %v1471_v29 }
 0x217   : >> { %1985 = vrcp.f32 %v1472_v1 }
 0x21b   : >> { %v1984_v34 = vpop.eup %1983 }
 0x21c   : >> { %v1475_v56 = vmul.f32 %v1984_v34, %v1471_v29 }
 0x21d   : >> { %v1986_v28 = vpop.eup %1985 }
 0x21e   : >> { %v1476_v31 = vmul.f32 %v1986_v28, %v1472_v1  ;;  %v1477_v48 = vsub.f32 2.0, %v1475_v56 }
 0x220   : >> { %v1478_v6 = vsub.f32 2.0, %v1476_v31  ;;  %v1479_v0 = vmul.f32 %v1984_v34, %v1477_v48 }
 0x222   : >> { %v1480_v14 = vmul.f32 %v1986_v28, %v1478_v6  ;;  %v1486_v58 = vmul.f32 %v1484_v15, %v1479_v0 }
 0x224   : >> { %v3102_v49 = vmul.f32 %v1484_v15, %v1480_v14  ;;  %v1539_v41 = vperm.slane %v1486_v58, 0  ;;  %v1545_v3 = vperm.slane %v1486_v58, 1  ;;  %v1551_v52 = vperm.slane %v1486_v58, 2 }
 0x225   : >> { %v1557_v20 = vperm.slane %v1486_v58, 3  ;;  %v1488_v57 = vadd.f32 1.0, %v1486_v58  ;;  %v1491_v5 = vmul.f32 -0.5, %v1486_v58  ;;  %v1494_v61 = vand.u32 2147483647, %v1486_v58 }
 0x226   : >> { %v1540_v33 = vperm.slane %v3102_v49, 0  ;;  %v1541_v55 = vmul.f32 %v1539_v41, %v3010_v21  ;;  %v1546_v22 = vperm.slane %v3102_v49, 1  ;;  %v1547_v40 = vmul.f32 %v1545_v3, %v3017_v44 }
 0x227   : >> { %v1552_v35 = vperm.slane %v3102_v49, 2  ;;  %v1553_v60 = vmul.f32 %v1551_v52, %v3024_v11  ;;  %v1558_v2 = vperm.slane %v3102_v49, 3  ;;  %v1559_v37 = vmul.f32 %v1557_v20, %v3003_v27 }
 0x228   : >> { %v1542_v39 = vmul.f32 %v1540_v33, %v3034_v50  ;;  %v1543_v21 = vadd.f32 %v1541_v55, %v2988_v53  ;;  %v1548_v44 = vmul.f32 %v1546_v22, %v3040_v7  ;;  %v1549_v32 = vadd.f32 %v1547_v40, %v2992_v23 }
 0x229   : >> { %v1554_v11 = vmul.f32 %v1552_v35, %v3046_v63  ;;  %v1560_v17 = vmul.f32 %v1558_v2, %v3028_v9  ;;  %v1515_v27 = vmul.f32 %v1513_v54, %v1479_v0  ;;  %v1555_v50 = vadd.f32 %v1553_v60, %v2996_v30 }
 0x22a   : >> { %v1544_v42 = vadd.f32 %v1542_v39, %v3006_v47  ;;  %v1550_v8 = vadd.f32 %v1548_v44, %v3013_v10  ;;  %1565 = vst [vmem:[%s3115_s28] sm:$0xff] %v1543_v21  ;;  %1987 = vlog2.f32 %v1488_v57  ;;  %v1497_v23 = vadd.f32 1.0, %v3102_v49 }
 0x22b   : >> { %v1556_v53 = vadd.f32 %v1554_v11, %v3020_v59  ;;  %1802 = vst [vmem:[%s3115_s28 + $0x20] sm:$0xff] %v1549_v32  ;;  %v1561_v9 = vadd.f32 %v1559_v37, %v2984_v46  ;;  %v1492_v7 = vadd.f32 1.0, %v1491_v5  ;;  %v1500_v47 = vmul.f32 -0.5, %v3102_v49 }
 0x22c   : >> { %1566 = vst [vmem:[%s3115_s28 + $0x8] sm:$0xff] %v1544_v42  ;;  %v1516_v10 = vmul.f32 %v1513_v54, %v1480_v14  ;;  %v1562_v63 = vadd.f32 %v1560_v17, %v2999_v62  ;;  %1989 = vlog2.f32 %v1497_v23  ;;  %v1517_v30 = vmul.f32 %v1515_v27, %v1479_v0 }
 0x22d   : >> { %1803 = vst [vmem:[%s3115_s28 + $0x28] sm:$0xff] %v1550_v8  ;;  %v1493_v24 = vmul.f32 %v1492_v7, %v1486_v58  ;;  %v1501_v46 = vadd.f32 1.0, %v1500_v47  ;;  %v1503_v45 = vand.u32 2147483647, %v3102_v49  ;;  %vm1495_vm5 = vcmp.lt.f32.partialorder %v1494_v61, 0.0004427343 }
 0x22e   : >> { %1805 = vst [vmem:[%s3115_s28 + $0x40] sm:$0xff] %v1555_v50  ;;  %v1518_v59 = vmul.f32 %v1516_v10, %v1480_v14  ;;  %v1519_v18 = vadd.f32 1.0, %v1517_v30  ;;  %v1522_v16 = vmul.f32 -0.5, %v1517_v30  ;;  %v1525_v6 = vand.u32 2147483647, %v1517_v30 }
 0x22f   : >> { %1806 = vst [vmem:[%s3115_s28 + $0x48] sm:$0xff] %v1556_v53  ;;  %v1502_v36 = vmul.f32 %v1501_v46, %v3102_v49  ;;  %vm1504_vm6 = vcmp.lt.f32.partialorder %v1503_v45, 0.0004427343 }
 0x230   : >> { %v1988_v51 = vpop.eup %1987  ;;  %1808 = vst [vmem:[%s3115_s28 + $0x60] sm:$0xff] %v1561_v9  ;;  %v1528_v43 = vadd.f32 1.0, %v1518_v59  ;;  %1991 = vlog2.f32 %v1519_v18  ;;  %v1531_v25 = vmul.f32 -0.5, %v1518_v59  ;;  %v1534_v34 = vand.u32 2147483647, %v1518_v59 }
 0x231   : >> { %1809 = vst [vmem:[%s3115_s28 + $0x68] sm:$0xff] %v1562_v63  ;;  %v1490_v12 = vmul.f32 0.6931472, %v1988_v51  ;;  %v1523_v31 = vadd.f32 1.0, %v1522_v16  ;;  %vm1526_vm8 = vcmp.lt.f32.partialorder %v1525_v6, 0.0004427343 }
 0x232   : >> { %1993 = vlog2.f32 %v1528_v43  ;;  %v1990_v62 = vpop.eup %1989  ;;  %v1532_v29 = vadd.f32 1.0, %v1531_v25  ;;  %vm1535_vm7 = vcmp.lt.f32.partialorder %v1534_v34, 0.0004427343 }
 0x233   : >> { %v1496_v38 = vsel %vm1495_vm5, %v1493_v24, %v1490_v12  ;;  %v1499_v26 = vmul.f32 0.6931472, %v1990_v62  ;;  %v1524_v49 = vmul.f32 %v1523_v31, %v1517_v30 }
 0x234   : >> { %v1506_v1 = vmul.f32 7.0, %v1496_v38  ;;  %v1533_v58 = vmul.f32 %v1532_v29, %v1518_v59 }
 0x235   : >> { %v1505_v19 = vsel %vm1504_vm6, %v1502_v36, %v1499_v26 }
 0x236   : >> { %v1992_v56 = vpop.eup %1991  ;;  %v1507_v28 = vmul.f32 7.0, %v1505_v19  ;;  %v1508_v41 = vadd.f32 %v1506_v1, %v3087_v4 }
 0x237   : >> { %v1521_v15 = vmul.f32 0.6931472, %v1992_v56 }
 0x238   : >> { %v1994_v48 = vpop.eup %1993  ;;  %v1509_v0 = vadd.f32 %v1507_v28, %v3091_v13 }
 0x239   : >> { %v1530_v14 = vmul.f32 0.6931472, %v1994_v48  ;;  %v1527_v20 = vsel %vm1526_vm8, %v1524_v49, %v1521_v15 }
 0x23a   : >> { %v1537_v57 = vadd.f32 %v1527_v20, %v1508_v41 }
 0x23b   : >> { %v1536_v3 = vsel %vm1535_vm7, %v1533_v58, %v1530_v14 }
 0x23c   : >> { %v1538_v52 = vadd.f32 %v1536_v3, %v1509_v0 }
 0x23d   : > { %265 = sbr.rel (!%p263_p11) target bundleno = 22 (0x16), region = 141 }
 0x23e   : >> { %v1584_v5 = vrot.slane %v1538_v52, 4 }
 0x240   : >> { %v1586_v33 = vsel %vm1585_vm9, %v1537_v57, %v1584_v5 }
 0x241   : >> { %1590 = vst [vmem:[%s1589_s29] sm:$0xff] %v1586_v33 }
 0x242   : > { %1602 = sbr.rel (!%p2146_p5) target bundleno = 596 (0x254), region = 51  ;;  %s1819_s13 = sshll.u32 (%p2146_p5), %s2129_s25, 5  ;;  %v1618_v4 = vld [vmem:[%s2167_s17] sm:$0xff] (%p2146_p5)  ;;  %v1620_v13 = vld [vmem:[%s2167_s17 + $0x8] sm:$0xff] (%p2146_p5)  ;;  %v1622_v55 = vld [vmem:[%s2167_s17 + $0x10] sm:$0xff] (%p2146_p5) }
 0x243   : > { %s1605_s16 = scalar_lea.vmem (%p2146_p5), %s3210_s5, %s1819_s13  ;;  %v1624_v22 = vld [vmem:[%s2167_s17 + $0x18] sm:$0xff] (%p2146_p5)  ;;  %v1626_v40 = vld [vmem:[%s2167_s17 + $0x20] sm:$0xff] (%p2146_p5)  ;;  %v1628_v35 = vld [vmem:[%s2167_s17 + $0x28] sm:$0xff] (%p2146_p5) }
 0x244   : > { %1619 = vst [vmem:[%s1605_s16] sm:$0xff] (%p2146_p5), %v1618_v4  ;;  %v1630_v60 = vld [vmem:[%s2167_s17 + $0x30] sm:$0xff] (%p2146_p5)  ;;  %v1632_v2 = vld [vmem:[%s2167_s17 + $0x38] sm:$0xff] (%p2146_p5)  ;;  %v1634_v37 = vld [vmem:[%s2167_s17 + $0x40] sm:$0xff] (%p2146_p5) }
 0x245   : > { %1621 = vst [vmem:[%s1605_s16 + $0x8] sm:$0xff] (%p2146_p5), %v1620_v13  ;;  %v1636_v39 = vld [vmem:[%s2167_s17 + $0x48] sm:$0xff] (%p2146_p5)  ;;  %v1638_v21 = vld [vmem:[%s2167_s17 + $0x50] sm:$0xff] (%p2146_p5)  ;;  %v1640_v44 = vld [vmem:[%s2167_s17 + $0x58] sm:$0xff] (%p2146_p5) }
 0x246   : > { %1623 = vst [vmem:[%s1605_s16 + $0x10] sm:$0xff] (%p2146_p5), %v1622_v55  ;;  %v1642_v32 = vld [vmem:[%s2167_s17 + $0x60] sm:$0xff] (%p2146_p5)  ;;  %v1644_v54 = vld [vmem:[%s2167_s17 + $0x68] sm:$0xff] (%p2146_p5)  ;;  %v1646_v11 = vld [vmem:[%s2167_s17 + $0x70] sm:$0xff] (%p2146_p5) }
 0x247   : > { %1625 = vst [vmem:[%s1605_s16 + $0x18] sm:$0xff] %v1624_v22  ;;  %v1648_v17 = vld [vmem:[%s2167_s17 + $0x78] sm:$0xff] }
 0x248   : > { %1627 = vst [vmem:[%s1605_s16 + $0x40] sm:$0xff] %v1626_v40 }
 0x249   : > { %1629 = vst [vmem:[%s1605_s16 + $0x48] sm:$0xff] %v1628_v35 }
 0x24a   : > { %1631 = vst [vmem:[%s1605_s16 + $0x50] sm:$0xff] %v1630_v60 }
 0x24b   : > { %1633 = vst [vmem:[%s1605_s16 + $0x58] sm:$0xff] %v1632_v2 }
 0x24c   : > { %1635 = vst [vmem:[%s1605_s16 + $0x80] sm:$0xff] %v1634_v37 }
 0x24d   : > { %1637 = vst [vmem:[%s1605_s16 + $0x88] sm:$0xff] %v1636_v39 }
 0x24e   : > { %1639 = vst [vmem:[%s1605_s16 + $0x90] sm:$0xff] %v1638_v21 }
 0x24f   : > { %1641 = vst [vmem:[%s1605_s16 + $0x98] sm:$0xff] %v1640_v44 }
 0x250   : > { %1643 = vst [vmem:[%s1605_s16 + $0xc0] sm:$0xff] %v1642_v32 }
 0x251   : > { %1645 = vst [vmem:[%s1605_s16 + $0xc8] sm:$0xff] %v1644_v54 }
 0x252   : > { %1647 = vst [vmem:[%s1605_s16 + $0xd0] sm:$0xff] %v1646_v11 }
 0x253   : > { %1649 = vst [vmem:[%s1605_s16 + $0xd8] sm:$0xff] %v1648_v17 }
 0x254 PF: > { %s1820_s12 = sshll.u32 %s2129_s25, 4  ;;  %s1662_s15 = sshll.u32 %s2169_s18, 4  ;;  %s1663_s15 = int_to_ptr.vmem [resolvable:$true] %s1662_s15 }
 0x255   : > { %s1660_s28 = scalar_lea.hbm %s3211_s6, %s1820_s12  ;;  %s2015_s11 = scalar_lea.hbm %s3211_s6, 32 }
 0x256   : > { %s1664_s14 = sshll.u32 %s1660_s28, 4  ;;  %s1665_s14 = int_to_ptr.hbm [resolvable:$true] %s1664_s14 }
 0x257   : > { %s2009_s29 = sshra.s32 %s1665_s14, 4  ;;  %s2010_s29 = int_to_ptr.hbm [resolvable:$true] %s2009_s29 }
 0x258   : > { %s2011_s13 = scalar_lea.hbm %s2010_s29, 16  ;;  %p2016_p1 = scmp.lt.s32.totalorder %s2010_s29, %s3211_s6 }
 0x259   : > { %p2012_p12 = scmp.ne.s32.totalorder %s2010_s29, %s2011_s13  ;;  %p2017_p2 = scmp.lt.s32.totalorder %s2015_s11, %s2011_s13 }
 0x25b   : > { %p2013_p13 = pnand %p2012_p12, %p2146_p5  ;;  %p2018_p3 = por %p2017_p2, %p2016_p1 }
 0x25d   : > { %p2014_p0 = pneg %p2013_p13 }
 0x25f   : > { %p2019_p4 = pnand %p2018_p3, %p2014_p0 }
 0x261   : > { %2022 = shalt.err (!%p2019_p4)
}
 0x262   : > { %1821 = dma.vmem_to_hbm [thread:$0]  (%p2146_p5), %s1663_s15, 256, %s1665_s14, %s1596_s10  }
 0x263 PF: > { %p1827_p7 = scmp.ge.s32.totalorder %s2061_s24, 2  ;;  %s1683_s16 = sand.u32 1, %s2049_s21  }
 0x264   : > { %s1684_s12 = scalar_lea.sflag [#allocation4], %s1683_s16 }
 0x265   : > { %p1824_p8 = pnand %p1827_p7, %p2150_p6 }
 0x267   : > { %p1825_p9 = pneg %p1824_p8 }
 0x269   : > { %2044 = dma.done.wait (%p1825_p9), %s1684_s12, 256  }
 0x26a   : > { %2046 = vsyncadd (%p1825_p9), %s1684_s12, 4294967040  ;;  %p17_p10 = scmp.ge.s32.totalorder %s2133_s27, 4   ;;  %s3246_s21 = smov %s2053_s22 }
 0x26b   : > { %s3247_s22 = smov %s2057_s23  ;;  %s3248_s23 = smov %s2144_s30 }
 0x26c   : > { %s3249_s24 = smov %s2133_s27  ;;  %19 = sbr.rel (!%p17_p10) target bundleno = 3 (0x3), region = 152 }
 0x271   :  { %1690 = vsyncpa [#allocation4], 1 }
 0x272   :  { %1692 = vsyncpa [#allocation4 + $0x1], 1 }

</bundles_post_ra>
